<compile_context>
chip_gen: v6e
topology: v6e:2x2x1
jax: 0.10.0
libtpu: 0.0.40
codegen_flags: <defaults>
</compile_context>

<pallas_src>
import functools
import math

import jax
import jax.numpy as jnp
from jax.experimental import pallas as pl
from jax.experimental.pallas import tpu as pltpu


# -----------------------------------------------------------------------------
# Kernel 1: full-softmax path (single key tile), optional T-folding.
# Blocks: q/k/v (Tb,S,HD), ot (Tb,S,S), out (Tb,S,HD), attn (Tb,H,S,S);
# scratch: ctx (S,HD) f32.
# -----------------------------------------------------------------------------
def _full_softmax_kernel(*refs, Tb, H, D, scale, has_ot, output_attention,
                         folded):
    q_ref, k_ref, v_ref = refs[0], refs[1], refs[2]
    i = 3
    ot_ref = None
    if has_ot:
        ot_ref = refs[i]
        i += 1
    o_ref = refs[i]
    i += 1
    attn_ref = None
    if output_attention:
        attn_ref = refs[i]
        i += 1
    ctx_ref = refs[i]                                      # (S, HD) f32 scratch

    for t in range(Tb):
        # Folded: block holds all T timesteps; pick (t+1)%T keys in-block.
        # Unfolded: the BlockSpec already delivered the next timestep's K/V.
        nt = (t + 1) % Tb if folded else t
        q = q_ref[t]                                       # (S, HD) native dtype
        k = k_ref[nt]
        v = v_ref[nt]
        if has_ot:
            # softmax(z + log(OT+eps)) == normalize((OT+eps) * exp(z - max(z)))
            # -> no per-element log (EUP), shared by all heads.
            ot = ot_ref[t].astype(jnp.float32) + 1e-8      # (S, S)

        for h in range(H):
            lo = h * D
            qh = q[:, lo:lo + D]                           # (S, D)
            kh = k[:, lo:lo + D]
            vh = v[:, lo:lo + D]

            scores = jax.lax.dot_general(
                qh, kh, (((1,), (1,)), ((), ())),
                preferred_element_type=jnp.float32)        # (S, S) f32
            scores = scores * scale                        # exact f32 scaling

            m = jnp.max(scores, axis=-1, keepdims=True)
            p = jnp.exp(scores - m)
            if has_ot:
                p = p * ot
            denom = jnp.sum(p, axis=-1, keepdims=True)

            if output_attention:
                attn = p / denom                           # exact: rows sum to 1
                attn_ref[t, h, :, :] = attn.astype(attn_ref.dtype)
            else:
                attn = p * pl.reciprocal(denom, approx=True)   # EUP slot

            # Stream this head's context into the f32 scratch (off DMA path).
            ctx_ref[:, lo:lo + D] = jnp.dot(
                attn.astype(v.dtype), vh,
                preferred_element_type=jnp.float32)

        # One lane-dense, full-width store per timestep.
        o_ref[t, :, :] = ctx_ref[...].astype(o_ref.dtype)


# -----------------------------------------------------------------------------
# Kernel 2: key-tiled (flash) path with online softmax.
# Grid (BT, S//Tk); blocks: q (1,S,HD), k/v (1,Tk,HD), ot (1,S,Tk),
# out (1,S,HD); scratch: m,l (H,S,1) f32, acc (S,HD) f32.
# -----------------------------------------------------------------------------
def _flash_kernel(*refs, H, D, scale, has_ot):
    q_ref, k_ref, v_ref = refs[0], refs[1], refs[2]
    i = 3
    ot_ref = None
    if has_ot:
        ot_ref = refs[i]
        i += 1
    o_ref = refs[i]
    m_ref, l_ref, acc_ref = refs[i + 1], refs[i + 2], refs[i + 3]

    j = pl.program_id(1)

    @pl.when(j == 0)
    def _init():
        m_ref[...] = jnp.full(m_ref.shape, -jnp.inf, m_ref.dtype)
        l_ref[...] = jnp.zeros(l_ref.shape, l_ref.dtype)
        acc_ref[...] = jnp.zeros(acc_ref.shape, acc_ref.dtype)

    q = q_ref[0]                                           # (S, HD)
    k = k_ref[0]                                           # (Tk, HD)
    v = v_ref[0]
    if has_ot:
        ot = ot_ref[0].astype(jnp.float32) + 1e-8          # (S, Tk)

    for h in range(H):
        lo = h * D
        qh = q[:, lo:lo + D]
        kh = k[:, lo:lo + D]
        vh = v[:, lo:lo + D]

        scores = jax.lax.dot_general(
            qh, kh, (((1,), (1,)), ((), ())),
            preferred_element_type=jnp.float32) * scale    # (S, Tk) f32

        m_prev = m_ref[h]                                  # (S, 1)
        l_prev = l_ref[h]
        m_new = jnp.maximum(m_prev, jnp.max(scores, axis=-1, keepdims=True))
        alpha = jnp.exp(m_prev - m_new)
        p = jnp.exp(scores - m_new)
        if has_ot:
            p = p * ot                                     # == exp(z+log(ot)-m)
        l_ref[h] = alpha * l_prev + jnp.sum(p, axis=-1, keepdims=True)
        m_ref[h] = m_new
        acc_ref[:, lo:lo + D] = alpha * acc_ref[:, lo:lo + D] + jnp.dot(
            p.astype(v.dtype), vh, preferred_element_type=jnp.float32)

    @pl.when(j == pl.num_programs(1) - 1)
    def _finalize():
        for h in range(H):
            lo = h * D
            acc_ref[:, lo:lo + D] = acc_ref[:, lo:lo + D] * pl.reciprocal(
                l_ref[h], approx=True)
        o_ref[0, :, :] = acc_ref[...].astype(o_ref.dtype)


# -----------------------------------------------------------------------------
# Wrapper
# -----------------------------------------------------------------------------
def conditioned_attention(queries, keys, values, attn_mask=None,
                          OT_matrices=None, output_attention=False,
                          attn_dtype=None, compute_dtype=None,
                          kv_block_size=None, fold_time=None):
    """JAX/Pallas equivalent of ConditionedAttention.forward (eval mode).

    queries/keys/values: (B, T, S, H, D). Returns (output, attn_or_None) with
    output (B, T, S, H, D) and attn (B, T, H, S, S) if requested.
    attn_mask is accepted but ignored (as in the reference forward).
    """
    del attn_mask  # unused in the reference forward as well
    B, T, S, H, D = queries.shape
    BT, HD = B * T, H * D
    scale = float(1.0 / math.sqrt(D))
    has_ot = OT_matrices is not None
    out_dtype = queries.dtype
    adt = jnp.dtype(attn_dtype) if attn_dtype is not None else jnp.dtype(out_dtype)

    if compute_dtype is not None:
        queries = queries.astype(compute_dtype)
        keys = keys.astype(compute_dtype)
        values = values.astype(compute_dtype)
        if has_ot:
            OT_matrices = OT_matrices.astype(compute_dtype)

    # Free reshapes only (contiguous folds) — no HBM relayout.
    q2 = queries.reshape(BT, S, HD)
    k2 = keys.reshape(BT, S, HD)
    v2 = values.reshape(BT, S, HD)
    ot2 = OT_matrices.reshape(BT, S, S) if has_ot else None

    isz = jnp.dtype(q2.dtype).itemsize
    ot_isz = jnp.dtype(ot2.dtype).itemsize if has_ot else 0
    a_isz = adt.itemsize

    def _next_row(i):  # flattened (b, t) -> flattened (b, (t+1) % T)
        return (i // T) * T + ((i % T) + 1) % T

    # ------------------------------------------------------------------ flash
    tk = None
    if not output_attention and S % 128 == 0:
        if kv_block_size is not None:
            c = int(kv_block_size)
            if c % 128 == 0 and S % c == 0 and c < S:
                tk = c
        elif S >= 1024:
            for c in (512, 256, 128):
                if S % c == 0:
                    tk = c
                    break
    use_flash = tk is not None

    if use_flash:
        nkv = S // tk
        in_specs = [
            pl.BlockSpec((1, S, HD), lambda i, j: (i, 0, 0)),
            pl.BlockSpec((1, tk, HD), lambda i, j: (_next_row(i), j, 0)),
            pl.BlockSpec((1, tk, HD), lambda i, j: (_next_row(i), j, 0)),
        ]
        args = [q2, k2, v2]
        if has_ot:
            in_specs.append(pl.BlockSpec((1, S, tk), lambda i, j: (i, 0, j)))
            args.append(ot2)
        out_shape = (jax.ShapeDtypeStruct((BT, S, HD), out_dtype),)
        out_specs = (pl.BlockSpec((1, S, HD), lambda i, j: (i, 0, 0)),)
        scratch = [pltpu.VMEM((H, S, 1), jnp.float32),
                   pltpu.VMEM((H, S, 1), jnp.float32),
                   pltpu.VMEM((S, HD), jnp.float32)]
        grid = (BT, nkv)
        semantics = ("parallel", "arbitrary")
        kernel = functools.partial(_flash_kernel, H=H, D=D, scale=scale,
                                   has_ot=has_ot)
        in_block = S * HD * isz + 2 * tk * HD * isz + (S * tk * ot_isz if has_ot else 0)
        out_block = S * HD * isz
        scratch_b = S * HD * 4 + 2 * H * S * 128 * 4
        interm = 6 * S * tk * 4
    # ----------------------------------------------------------------- simple
    else:
        per_bt_in = 3 * S * HD * isz + (S * S * ot_isz if has_ot else 0)
        per_bt_out = S * HD * isz + (H * S * S * a_isz if output_attention else 0)
        if fold_time is None:
            fold = (T > 1 and S * HD * isz < (512 << 10)
                    and 2 * T * (per_bt_in + per_bt_out) + S * HD * 4
                    + 6 * S * S * 4 < (40 << 20))
        else:
            fold = bool(fold_time) and T > 1
        Tb = T if fold else 1

        if fold:
            q_map = lambda b: (b, 0, 0)
            kv_map = q_map
            a_map = lambda b: (b, 0, 0, 0)
            grid = (B,)
        else:
            q_map = lambda i: (i, 0, 0)
            kv_map = lambda i: (_next_row(i), 0, 0)
            a_map = lambda i: (i, 0, 0, 0)
            grid = (BT,)

        in_specs = [pl.BlockSpec((Tb, S, HD), q_map),
                    pl.BlockSpec((Tb, S, HD), kv_map),
                    pl.BlockSpec((Tb, S, HD), kv_map)]
        args = [q2, k2, v2]
        if has_ot:
            in_specs.append(pl.BlockSpec((Tb, S, S), q_map))
            args.append(ot2)
        out_shape = [jax.ShapeDtypeStruct((BT, S, HD), out_dtype)]
        out_specs = [pl.BlockSpec((Tb, S, HD), q_map)]
        if output_attention:
            out_shape.append(jax.ShapeDtypeStruct((BT, H, S, S), adt))
            out_specs.append(pl.BlockSpec((Tb, H, S, S), a_map))
        out_shape = tuple(out_shape)
        out_specs = tuple(out_specs)
        scratch = [pltpu.VMEM((S, HD), jnp.float32)]
        semantics = ("parallel",)
        kernel = functools.partial(_full_softmax_kernel, Tb=Tb, H=H, D=D,
                                   scale=scale, has_ot=has_ot,
                                   output_attention=output_attention,
                                   folded=fold)
        in_block = Tb * per_bt_in
        out_block = Tb * per_bt_out
        scratch_b = S * HD * 4
        interm = 6 * S * S * 4

    # Scoped VMEM sized to the real footprint (x2 for double buffering).
    vmem_needed = 2 * (in_block + out_block) + scratch_b + interm
    vmem_limit = int(min(max(vmem_needed + (4 << 20), 32 << 20), 128 << 20))

    bytes_accessed = 4 * BT * S * HD * isz
    if has_ot:
        bytes_accessed += BT * S * S * ot_isz
    if output_attention:
        bytes_accessed += BT * H * S * S * a_isz
    cost = pl.CostEstimate(flops=4 * BT * H * S * S * D,        # QK^T + PV
                           transcendentals=BT * H * S * S,      # exp only
                           bytes_accessed=int(bytes_accessed))

    results = pl.pallas_call(
        kernel,
        grid=grid,
        in_specs=in_specs,
        out_specs=out_specs,
        out_shape=out_shape,
        scratch_shapes=scratch,
        compiler_params=pltpu.CompilerParams(
            dimension_semantics=semantics,
            vmem_limit_bytes=vmem_limit),
        cost_estimate=cost,
    )(*args)

    out = results[0].reshape(B, T, S, H, D)
    if output_attention:
        return out, results[1].reshape(B, T, H, S, S)
    return out, None


def _reference(queries, keys, values, OT_matrices=None):
    """Pure-JAX reference mirroring the PyTorch loop (for verification)."""
    kn = jnp.roll(keys, -1, axis=1)       # keys[:, (t+1) % T]
    vn = jnp.roll(values, -1, axis=1)
    D = queries.shape[-1]
    scores = jnp.einsum('btshd,btqhd->bthsq', queries, kn) / math.sqrt(D)
    if OT_matrices is not None:
        scores = scores + jnp.log(OT_matrices + 1e-8)[:, :, None, :, :]
    attn = jax.nn.softmax(scores, axis=-1)
    ctx = jnp.einsum('bthsq,btqhd->bthsd', attn, vn)
    return jnp.transpose(ctx, (0, 1, 3, 2, 4))


if __name__ == "__main__":
    B, T, S, H, D = 2, 3, 8, 4, 32
    key = jax.random.PRNGKey(0)
    kq, kk, kv, kot = jax.random.split(key, 4)
    queries = jax.random.normal(kq, (B, T, S, H, D), dtype=jnp.float32)
    keys = jax.random.normal(kk, (B, T, S, H, D), dtype=jnp.float32)
    values = jax.random.normal(kv, (B, T, S, H, D), dtype=jnp.float32)
    OT = jax.nn.softmax(jax.random.normal(kot, (B, T, S, S), jnp.float32), axis=-1)
    ref = _reference(queries, keys, values, OT)

    # 1) OT bias, auto grid-coarsening (folded T) path
    out, attn = conditioned_attention(queries, keys, values, attn_mask=None,
                                      OT_matrices=OT, output_attention=False)
    out = jax.block_until_ready(out)
    assert attn is None and out.shape == (B, T, S, H, D)
    assert jnp.allclose(out, ref, atol=2e-2, rtol=2e-2), \
        f"max abs err = {jnp.max(jnp.abs(out - ref))}"

    # 1b) same computation, unfolded (grid = B*T) path
    out1b, _ = conditioned_attention(queries, keys, values, OT_matrices=OT,
                                     fold_time=False)
    jax.block_until_ready(out1b)
    assert jnp.allclose(out1b, ref, atol=2e-2, rtol=2e-2)

    # 2) no-OT + output_attention path (exact softmax normalization)
    out2, attn2 = conditioned_attention(queries, keys, values,
                                        OT_matrices=None, output_attention=True)
    jax.block_until_ready(out2)
    ref2 = _reference(queries, keys, values, None)
    assert jnp.allclose(out2, ref2, atol=1e-2, rtol=1e-2)
    assert attn2.shape == (B, T, H, S, S)
    assert jnp.allclose(jnp.sum(attn2, axis=-1), 1.0, atol=1e-3)

    # 3) bf16 path: native-dtype operands straight to the MXU
    out3, _ = conditioned_attention(queries.astype(jnp.bfloat16),
                                    keys.astype(jnp.bfloat16),
                                    values.astype(jnp.bfloat16),
                                    OT_matrices=OT.astype(jnp.bfloat16))
    out3 = jax.block_until_ready(out3)
    assert out3.dtype == jnp.bfloat16
    assert bool(jnp.all(jnp.isfinite(out3.astype(jnp.float32))))
    assert jnp.max(jnp.abs(out3.astype(jnp.float32) - ref)) < 0.25

    # 4) wrapper-side bf16 compute_dtype downcast (f32 in / f32 out)
    out4, _ = conditioned_attention(queries, keys, values, OT_matrices=OT,
                                    compute_dtype=jnp.bfloat16)
    out4 = jax.block_until_ready(out4)
    assert out4.dtype == jnp.float32
    assert jnp.max(jnp.abs(out4 - ref)) < 0.25

    # 5) key-tiled (flash / online-softmax) path at S=256, Tk=128
    Bf, Tf, Sf, Hf, Df = 1, 2, 256, 2, 64
    kq2, kk2, kv2, kot2 = jax.random.split(jax.random.PRNGKey(1), 4)
    qf = jax.random.normal(kq2, (Bf, Tf, Sf, Hf, Df), dtype=jnp.float32)
    kf = jax.random.normal(kk2, (Bf, Tf, Sf, Hf, Df), dtype=jnp.float32)
    vf = jax.random.normal(kv2, (Bf, Tf, Sf, Hf, Df), dtype=jnp.float32)
    OTf = jax.nn.softmax(jax.random.normal(kot2, (Bf, Tf, Sf, Sf), jnp.float32),
                         axis=-1)
    out5, _ = conditioned_attention(qf, kf, vf, OT_matrices=OTf,
                                    kv_block_size=128)
    out5 = jax.block_until_ready(out5)
    ref5 = _reference(qf, kf, vf, OTf)
    assert jnp.allclose(out5, ref5, atol=2e-2, rtol=2e-2), \
        f"flash max abs err = {jnp.max(jnp.abs(out5 - ref5))}"

    print("KERNEL_OK")
</pallas_src>

<mosaic_0001>
module attributes {stable_mosaic.version = 11 : i64} {
  func.func @_full_softmax_kernel(%arg0: i32, %arg1: memref<3x8x128xf32, #tpu.memory_space<vmem>>, %arg2: memref<3x8x128xf32, #tpu.memory_space<vmem>>, %arg3: memref<3x8x128xf32, #tpu.memory_space<vmem>>, %arg4: memref<3x8x8xf32, #tpu.memory_space<vmem>>, %arg5: memref<3x8x128xf32, #tpu.memory_space<vmem>>, %arg6: memref<8x128xf32, #tpu.memory_space<vmem>>) attributes {dimension_semantics = [#tpu.dimension_semantics<parallel>], iteration_bounds = array<i64: 2>, scalar_prefetch = 0 : i64, scratch_operands = 1 : i64, tpu.core_type = #tpu.core_type<tc>, window_params = [{transform_indices = @transform_0, window_bounds = array<i64: 3, 8, 128>}, {transform_indices = @transform_1, window_bounds = array<i64: 3, 8, 128>}, {transform_indices = @transform_2, window_bounds = array<i64: 3, 8, 128>}, {transform_indices = @transform_3, window_bounds = array<i64: 3, 8, 8>}, {transform_indices = @transform_4, window_bounds = array<i64: 3, 8, 128>}]} {
    %c0 = arith.constant 0 : index
    %c0_0 = arith.constant 0 : index
    %c0_1 = arith.constant 0 : index
    %0 = vector.load %arg1[%c0, %c0_0, %c0_1] : memref<3x8x128xf32, #tpu.memory_space<vmem>>, vector<1x8x128xf32>
    %1 = vector.shape_cast %0 : vector<1x8x128xf32> to vector<8x128xf32>
    %c1 = arith.constant 1 : index
    %c0_2 = arith.constant 0 : index
    %c0_3 = arith.constant 0 : index
    %2 = vector.load %arg2[%c1, %c0_2, %c0_3] : memref<3x8x128xf32, #tpu.memory_space<vmem>>, vector<1x8x128xf32>
    %3 = vector.shape_cast %2 : vector<1x8x128xf32> to vector<8x128xf32>
    %c1_4 = arith.constant 1 : index
    %c0_5 = arith.constant 0 : index
    %c0_6 = arith.constant 0 : index
    %4 = vector.load %arg3[%c1_4, %c0_5, %c0_6] : memref<3x8x128xf32, #tpu.memory_space<vmem>>, vector<1x8x128xf32>
    %5 = vector.shape_cast %4 : vector<1x8x128xf32> to vector<8x128xf32>
    %c0_7 = arith.constant 0 : index
    %c0_8 = arith.constant 0 : index
    %c0_9 = arith.constant 0 : index
    %6 = vector.load %arg4[%c0_7, %c0_8, %c0_9] : memref<3x8x8xf32, #tpu.memory_space<vmem>>, vector<1x8x8xf32>
    %7 = vector.shape_cast %6 : vector<1x8x8xf32> to vector<8x8xf32>
    %cst = arith.constant 9.99999993E-9 : f32
    %8 = vector.broadcast %cst : f32 to vector<8x8xf32>
    %9 = arith.addf %7, %8 : vector<8x8xf32>
    %10 = vector.extract_strided_slice %1 {offsets = [0, 0], sizes = [8, 32], strides = [1, 1]} : vector<8x128xf32> to vector<8x32xf32>
    %11 = vector.extract_strided_slice %3 {offsets = [0, 0], sizes = [8, 32], strides = [1, 1]} : vector<8x128xf32> to vector<8x32xf32>
    %12 = vector.extract_strided_slice %5 {offsets = [0, 0], sizes = [8, 32], strides = [1, 1]} : vector<8x128xf32> to vector<8x32xf32>
    %cst_10 = arith.constant dense<0.000000e+00> : vector<8x8xf32>
    %13 = tpu.matmul %10, %11, %cst_10 {dimension_numbers = #tpu.dot_dimension_numbers<[1], [1], [0], [0], [0, 0, 1, 0], [], []>} : vector<8x32xf32>, vector<8x32xf32>, vector<8x8xf32> -> vector<8x8xf32>
    %cst_11 = arith.constant 0.176776692 : f32
    %14 = vector.broadcast %cst_11 : f32 to vector<8x8xf32>
    %15 = arith.mulf %13, %14 : vector<8x8xf32>
    %cst_12 = arith.constant dense<0xFF800000> : vector<8xf32>
    %16 = vector.multi_reduction <maximumf>, %15, %cst_12 [1] : vector<8x8xf32> to vector<8xf32>
    %17 = vector.shape_cast %16 : vector<8xf32> to vector<8x1xf32>
    %18 = vector.broadcast %17 : vector<8x1xf32> to vector<8x8xf32>
    %19 = arith.subf %15, %18 : vector<8x8xf32>
    %20 = math.exp %19 : vector<8x8xf32>
    %21 = arith.mulf %20, %9 : vector<8x8xf32>
    %cst_13 = arith.constant dense<0.000000e+00> : vector<8xf32>
    %22 = vector.multi_reduction <add>, %21, %cst_13 [1] : vector<8x8xf32> to vector<8xf32>
    %23 = vector.shape_cast %22 : vector<8xf32> to vector<8x1xf32>
    %24 = tpu.reciprocal %23 {approx = true} : vector<8x1xf32> -> vector<8x1xf32>
    %25 = vector.broadcast %24 : vector<8x1xf32> to vector<8x8xf32>
    %26 = arith.mulf %21, %25 : vector<8x8xf32>
    %cst_14 = arith.constant dense<0.000000e+00> : vector<8x32xf32>
    %27 = tpu.matmul %26, %12, %cst_14 {dimension_numbers = #tpu.dot_dimension_numbers<[1], [0], [0], [1], [0, 0, 1, 1], [], []>} : vector<8x8xf32>, vector<8x32xf32>, vector<8x32xf32> -> vector<8x32xf32>
    %c0_15 = arith.constant 0 : index
    %c0_16 = arith.constant 0 : index
    %28 = vector.load %arg6[%c0_15, %c0_16] : memref<8x128xf32, #tpu.memory_space<vmem>>, vector<8x32xf32>
    tpu.vector_store %arg6[%c0_15, %c0_16], %27 {strides = array<i32>} : memref<8x128xf32, #tpu.memory_space<vmem>>, vector<8x32xf32>,
    %29 = vector.extract_strided_slice %1 {offsets = [0, 32], sizes = [8, 32], strides = [1, 1]} : vector<8x128xf32> to vector<8x32xf32>
    %30 = vector.extract_strided_slice %3 {offsets = [0, 32], sizes = [8, 32], strides = [1, 1]} : vector<8x128xf32> to vector<8x32xf32>
    %31 = vector.extract_strided_slice %5 {offsets = [0, 32], sizes = [8, 32], strides = [1, 1]} : vector<8x128xf32> to vector<8x32xf32>
    %cst_17 = arith.constant dense<0.000000e+00> : vector<8x8xf32>
    %32 = tpu.matmul %29, %30, %cst_17 {dimension_numbers = #tpu.dot_dimension_numbers<[1], [1], [0], [0], [0, 0, 1, 0], [], []>} : vector<8x32xf32>, vector<8x32xf32>, vector<8x8xf32> -> vector<8x8xf32>
    %cst_18 = arith.constant 0.176776692 : f32
    %33 = vector.broadcast %cst_18 : f32 to vector<8x8xf32>
    %34 = arith.mulf %32, %33 : vector<8x8xf32>
    %cst_19 = arith.constant dense<0xFF800000> : vector<8xf32>
    %35 = vector.multi_reduction <maximumf>, %34, %cst_19 [1] : vector<8x8xf32> to vector<8xf32>
    %36 = vector.shape_cast %35 : vector<8xf32> to vector<8x1xf32>
    %37 = vector.broadcast %36 : vector<8x1xf32> to vector<8x8xf32>
    %38 = arith.subf %34, %37 : vector<8x8xf32>
    %39 = math.exp %38 : vector<8x8xf32>
    %40 = arith.mulf %39, %9 : vector<8x8xf32>
    %cst_20 = arith.constant dense<0.000000e+00> : vector<8xf32>
    %41 = vector.multi_reduction <add>, %40, %cst_20 [1] : vector<8x8xf32> to vector<8xf32>
    %42 = vector.shape_cast %41 : vector<8xf32> to vector<8x1xf32>
    %43 = tpu.reciprocal %42 {approx = true} : vector<8x1xf32> -> vector<8x1xf32>
    %44 = vector.broadcast %43 : vector<8x1xf32> to vector<8x8xf32>
    %45 = arith.mulf %40, %44 : vector<8x8xf32>
    %cst_21 = arith.constant dense<0.000000e+00> : vector<8x32xf32>
    %46 = tpu.matmul %45, %31, %cst_21 {dimension_numbers = #tpu.dot_dimension_numbers<[1], [0], [0], [1], [0, 0, 1, 1], [], []>} : vector<8x8xf32>, vector<8x32xf32>, vector<8x32xf32> -> vector<8x32xf32>
    %c0_22 = arith.constant 0 : index
    %c32 = arith.constant 32 : index
    %47 = vector.load %arg6[%c0_22, %c32] : memref<8x128xf32, #tpu.memory_space<vmem>>, vector<8x32xf32>
    tpu.vector_store %arg6[%c0_22, %c32], %46 {strides = array<i32>} : memref<8x128xf32, #tpu.memory_space<vmem>>, vector<8x32xf32>,
    %48 = vector.extract_strided_slice %1 {offsets = [0, 64], sizes = [8, 32], strides = [1, 1]} : vector<8x128xf32> to vector<8x32xf32>
    %49 = vector.extract_strided_slice %3 {offsets = [0, 64], sizes = [8, 32], strides = [1, 1]} : vector<8x128xf32> to vector<8x32xf32>
    %50 = vector.extract_strided_slice %5 {offsets = [0, 64], sizes = [8, 32], strides = [1, 1]} : vector<8x128xf32> to vector<8x32xf32>
    %cst_23 = arith.constant dense<0.000000e+00> : vector<8x8xf32>
    %51 = tpu.matmul %48, %49, %cst_23 {dimension_numbers = #tpu.dot_dimension_numbers<[1], [1], [0], [0], [0, 0, 1, 0], [], []>} : vector<8x32xf32>, vector<8x32xf32>, vector<8x8xf32> -> vector<8x8xf32>
    %cst_24 = arith.constant 0.176776692 : f32
    %52 = vector.broadcast %cst_24 : f32 to vector<8x8xf32>
    %53 = arith.mulf %51, %52 : vector<8x8xf32>
    %cst_25 = arith.constant dense<0xFF800000> : vector<8xf32>
    %54 = vector.multi_reduction <maximumf>, %53, %cst_25 [1] : vector<8x8xf32> to vector<8xf32>
    %55 = vector.shape_cast %54 : vector<8xf32> to vector<8x1xf32>
    %56 = vector.broadcast %55 : vector<8x1xf32> to vector<8x8xf32>
    %57 = arith.subf %53, %56 : vector<8x8xf32>
    %58 = math.exp %57 : vector<8x8xf32>
    %59 = arith.mulf %58, %9 : vector<8x8xf32>
    %cst_26 = arith.constant dense<0.000000e+00> : vector<8xf32>
    %60 = vector.multi_reduction <add>, %59, %cst_26 [1] : vector<8x8xf32> to vector<8xf32>
    %61 = vector.shape_cast %60 : vector<8xf32> to vector<8x1xf32>
    %62 = tpu.reciprocal %61 {approx = true} : vector<8x1xf32> -> vector<8x1xf32>
    %63 = vector.broadcast %62 : vector<8x1xf32> to vector<8x8xf32>
    %64 = arith.mulf %59, %63 : vector<8x8xf32>
    %cst_27 = arith.constant dense<0.000000e+00> : vector<8x32xf32>
    %65 = tpu.matmul %64, %50, %cst_27 {dimension_numbers = #tpu.dot_dimension_numbers<[1], [0], [0], [1], [0, 0, 1, 1], [], []>} : vector<8x8xf32>, vector<8x32xf32>, vector<8x32xf32> -> vector<8x32xf32>
    %c0_28 = arith.constant 0 : index
    %c64 = arith.constant 64 : index
    %66 = vector.load %arg6[%c0_28, %c64] : memref<8x128xf32, #tpu.memory_space<vmem>>, vector<8x32xf32>
    tpu.vector_store %arg6[%c0_28, %c64], %65 {strides = array<i32>} : memref<8x128xf32, #tpu.memory_space<vmem>>, vector<8x32xf32>,
    %67 = vector.extract_strided_slice %1 {offsets = [0, 96], sizes = [8, 32], strides = [1, 1]} : vector<8x128xf32> to vector<8x32xf32>
    %68 = vector.extract_strided_slice %3 {offsets = [0, 96], sizes = [8, 32], strides = [1, 1]} : vector<8x128xf32> to vector<8x32xf32>
    %69 = vector.extract_strided_slice %5 {offsets = [0, 96], sizes = [8, 32], strides = [1, 1]} : vector<8x128xf32> to vector<8x32xf32>
    %cst_29 = arith.constant dense<0.000000e+00> : vector<8x8xf32>
    %70 = tpu.matmul %67, %68, %cst_29 {dimension_numbers = #tpu.dot_dimension_numbers<[1], [1], [0], [0], [0, 0, 1, 0], [], []>} : vector<8x32xf32>, vector<8x32xf32>, vector<8x8xf32> -> vector<8x8xf32>
    %cst_30 = arith.constant 0.176776692 : f32
    %71 = vector.broadcast %cst_30 : f32 to vector<8x8xf32>
    %72 = arith.mulf %70, %71 : vector<8x8xf32>
    %cst_31 = arith.constant dense<0xFF800000> : vector<8xf32>
    %73 = vector.multi_reduction <maximumf>, %72, %cst_31 [1] : vector<8x8xf32> to vector<8xf32>
    %74 = vector.shape_cast %73 : vector<8xf32> to vector<8x1xf32>
    %75 = vector.broadcast %74 : vector<8x1xf32> to vector<8x8xf32>
    %76 = arith.subf %72, %75 : vector<8x8xf32>
    %77 = math.exp %76 : vector<8x8xf32>
    %78 = arith.mulf %77, %9 : vector<8x8xf32>
    %cst_32 = arith.constant dense<0.000000e+00> : vector<8xf32>
    %79 = vector.multi_reduction <add>, %78, %cst_32 [1] : vector<8x8xf32> to vector<8xf32>
    %80 = vector.shape_cast %79 : vector<8xf32> to vector<8x1xf32>
    %81 = tpu.reciprocal %80 {approx = true} : vector<8x1xf32> -> vector<8x1xf32>
    %82 = vector.broadcast %81 : vector<8x1xf32> to vector<8x8xf32>
    %83 = arith.mulf %78, %82 : vector<8x8xf32>
    %cst_33 = arith.constant dense<0.000000e+00> : vector<8x32xf32>
    %84 = tpu.matmul %83, %69, %cst_33 {dimension_numbers = #tpu.dot_dimension_numbers<[1], [0], [0], [1], [0, 0, 1, 1], [], []>} : vector<8x8xf32>, vector<8x32xf32>, vector<8x32xf32> -> vector<8x32xf32>
    %c0_34 = arith.constant 0 : index
    %c96 = arith.constant 96 : index
    %85 = vector.load %arg6[%c0_34, %c96] : memref<8x128xf32, #tpu.memory_space<vmem>>, vector<8x32xf32>
    tpu.vector_store %arg6[%c0_34, %c96], %84 {strides = array<i32>} : memref<8x128xf32, #tpu.memory_space<vmem>>, vector<8x32xf32>,
    %c0_35 = arith.constant 0 : index
    %c0_36 = arith.constant 0 : index
    %86 = vector.load %arg6[%c0_35, %c0_36] : memref<8x128xf32, #tpu.memory_space<vmem>>, vector<8x128xf32>
    %c0_37 = arith.constant 0 : index
    %c0_38 = arith.constant 0 : index
    %c0_39 = arith.constant 0 : index
    %87 = vector.load %arg5[%c0_37, %c0_38, %c0_39] : memref<3x8x128xf32, #tpu.memory_space<vmem>>, vector<1x8x128xf32>
    %88 = vector.shape_cast %87 : vector<1x8x128xf32> to vector<8x128xf32>
    %89 = vector.shape_cast %86 : vector<8x128xf32> to vector<1x8x128xf32>
    tpu.vector_store %arg5[%c0_37, %c0_38, %c0_39], %89 {strides = array<i32>} : memref<3x8x128xf32, #tpu.memory_space<vmem>>, vector<1x8x128xf32>,
    %c1_40 = arith.constant 1 : index
    %c0_41 = arith.constant 0 : index
    %c0_42 = arith.constant 0 : index
    %90 = vector.load %arg1[%c1_40, %c0_41, %c0_42] : memref<3x8x128xf32, #tpu.memory_space<vmem>>, vector<1x8x128xf32>
    %91 = vector.shape_cast %90 : vector<1x8x128xf32> to vector<8x128xf32>
    %c2 = arith.constant 2 : index
    %c0_43 = arith.constant 0 : index
    %c0_44 = arith.constant 0 : index
    %92 = vector.load %arg2[%c2, %c0_43, %c0_44] : memref<3x8x128xf32, #tpu.memory_space<vmem>>, vector<1x8x128xf32>
    %93 = vector.shape_cast %92 : vector<1x8x128xf32> to vector<8x128xf32>
    %c2_45 = arith.constant 2 : index
    %c0_46 = arith.constant 0 : index
    %c0_47 = arith.constant 0 : index
    %94 = vector.load %arg3[%c2_45, %c0_46, %c0_47] : memref<3x8x128xf32, #tpu.memory_space<vmem>>, vector<1x8x128xf32>
    %95 = vector.shape_cast %94 : vector<1x8x128xf32> to vector<8x128xf32>
    %c1_48 = arith.constant 1 : index
    %c0_49 = arith.constant 0 : index
    %c0_50 = arith.constant 0 : index
    %96 = vector.load %arg4[%c1_48, %c0_49, %c0_50] : memref<3x8x8xf32, #tpu.memory_space<vmem>>, vector<1x8x8xf32>
    %97 = vector.shape_cast %96 : vector<1x8x8xf32> to vector<8x8xf32>
    %cst_51 = arith.constant 9.99999993E-9 : f32
    %98 = vector.broadcast %cst_51 : f32 to vector<8x8xf32>
    %99 = arith.addf %97, %98 : vector<8x8xf32>
    %100 = vector.extract_strided_slice %91 {offsets = [0, 0], sizes = [8, 32], strides = [1, 1]} : vector<8x128xf32> to vector<8x32xf32>
    %101 = vector.extract_strided_slice %93 {offsets = [0, 0], sizes = [8, 32], strides = [1, 1]} : vector<8x128xf32> to vector<8x32xf32>
    %102 = vector.extract_strided_slice %95 {offsets = [0, 0], sizes = [8, 32], strides = [1, 1]} : vector<8x128xf32> to vector<8x32xf32>
    %cst_52 = arith.constant dense<0.000000e+00> : vector<8x8xf32>
    %103 = tpu.matmul %100, %101, %cst_52 {dimension_numbers = #tpu.dot_dimension_numbers<[1], [1], [0], [0], [0, 0, 1, 0], [], []>} : vector<8x32xf32>, vector<8x32xf32>, vector<8x8xf32> -> vector<8x8xf32>
    %cst_53 = arith.constant 0.176776692 : f32
    %104 = vector.broadcast %cst_53 : f32 to vector<8x8xf32>
    %105 = arith.mulf %103, %104 : vector<8x8xf32>
    %cst_54 = arith.constant dense<0xFF800000> : vector<8xf32>
    %106 = vector.multi_reduction <maximumf>, %105, %cst_54 [1] : vector<8x8xf32> to vector<8xf32>
    %107 = vector.shape_cast %106 : vector<8xf32> to vector<8x1xf32>
    %108 = vector.broadcast %107 : vector<8x1xf32> to vector<8x8xf32>
    %109 = arith.subf %105, %108 : vector<8x8xf32>
    %110 = math.exp %109 : vector<8x8xf32>
    %111 = arith.mulf %110, %99 : vector<8x8xf32>
    %cst_55 = arith.constant dense<0.000000e+00> : vector<8xf32>
    %112 = vector.multi_reduction <add>, %111, %cst_55 [1] : vector<8x8xf32> to vector<8xf32>
    %113 = vector.shape_cast %112 : vector<8xf32> to vector<8x1xf32>
    %114 = tpu.reciprocal %113 {approx = true} : vector<8x1xf32> -> vector<8x1xf32>
    %115 = vector.broadcast %114 : vector<8x1xf32> to vector<8x8xf32>
    %116 = arith.mulf %111, %115 : vector<8x8xf32>
    %cst_56 = arith.constant dense<0.000000e+00> : vector<8x32xf32>
    %117 = tpu.matmul %116, %102, %cst_56 {dimension_numbers = #tpu.dot_dimension_numbers<[1], [0], [0], [1], [0, 0, 1, 1], [], []>} : vector<8x8xf32>, vector<8x32xf32>, vector<8x32xf32> -> vector<8x32xf32>
    %c0_57 = arith.constant 0 : index
    %c0_58 = arith.constant 0 : index
    %118 = vector.load %arg6[%c0_57, %c0_58] : memref<8x128xf32, #tpu.memory_space<vmem>>, vector<8x32xf32>
    tpu.vector_store %arg6[%c0_57, %c0_58], %117 {strides = array<i32>} : memref<8x128xf32, #tpu.memory_space<vmem>>, vector<8x32xf32>,
    %119 = vector.extract_strided_slice %91 {offsets = [0, 32], sizes = [8, 32], strides = [1, 1]} : vector<8x128xf32> to vector<8x32xf32>
    %120 = vector.extract_strided_slice %93 {offsets = [0, 32], sizes = [8, 32], strides = [1, 1]} : vector<8x128xf32> to vector<8x32xf32>
    %121 = vector.extract_strided_slice %95 {offsets = [0, 32], sizes = [8, 32], strides = [1, 1]} : vector<8x128xf32> to vector<8x32xf32>
    %cst_59 = arith.constant dense<0.000000e+00> : vector<8x8xf32>
    %122 = tpu.matmul %119, %120, %cst_59 {dimension_numbers = #tpu.dot_dimension_numbers<[1], [1], [0], [0], [0, 0, 1, 0], [], []>} : vector<8x32xf32>, vector<8x32xf32>, vector<8x8xf32> -> vector<8x8xf32>
    %cst_60 = arith.constant 0.176776692 : f32
    %123 = vector.broadcast %cst_60 : f32 to vector<8x8xf32>
    %124 = arith.mulf %122, %123 : vector<8x8xf32>
    %cst_61 = arith.constant dense<0xFF800000> : vector<8xf32>
    %125 = vector.multi_reduction <maximumf>, %124, %cst_61 [1] : vector<8x8xf32> to vector<8xf32>
    %126 = vector.shape_cast %125 : vector<8xf32> to vector<8x1xf32>
    %127 = vector.broadcast %126 : vector<8x1xf32> to vector<8x8xf32>
    %128 = arith.subf %124, %127 : vector<8x8xf32>
    %129 = math.exp %128 : vector<8x8xf32>
    %130 = arith.mulf %129, %99 : vector<8x8xf32>
    %cst_62 = arith.constant dense<0.000000e+00> : vector<8xf32>
    %131 = vector.multi_reduction <add>, %130, %cst_62 [1] : vector<8x8xf32> to vector<8xf32>
    %132 = vector.shape_cast %131 : vector<8xf32> to vector<8x1xf32>
    %133 = tpu.reciprocal %132 {approx = true} : vector<8x1xf32> -> vector<8x1xf32>
    %134 = vector.broadcast %133 : vector<8x1xf32> to vector<8x8xf32>
    %135 = arith.mulf %130, %134 : vector<8x8xf32>
    %cst_63 = arith.constant dense<0.000000e+00> : vector<8x32xf32>
    %136 = tpu.matmul %135, %121, %cst_63 {dimension_numbers = #tpu.dot_dimension_numbers<[1], [0], [0], [1], [0, 0, 1, 1], [], []>} : vector<8x8xf32>, vector<8x32xf32>, vector<8x32xf32> -> vector<8x32xf32>
    %c0_64 = arith.constant 0 : index
    %c32_65 = arith.constant 32 : index
    %137 = vector.load %arg6[%c0_64, %c32_65] : memref<8x128xf32, #tpu.memory_space<vmem>>, vector<8x32xf32>
    tpu.vector_store %arg6[%c0_64, %c32_65], %136 {strides = array<i32>} : memref<8x128xf32, #tpu.memory_space<vmem>>, vector<8x32xf32>,
    %138 = vector.extract_strided_slice %91 {offsets = [0, 64], sizes = [8, 32], strides = [1, 1]} : vector<8x128xf32> to vector<8x32xf32>
    %139 = vector.extract_strided_slice %93 {offsets = [0, 64], sizes = [8, 32], strides = [1, 1]} : vector<8x128xf32> to vector<8x32xf32>
    %140 = vector.extract_strided_slice %95 {offsets = [0, 64], sizes = [8, 32], strides = [1, 1]} : vector<8x128xf32> to vector<8x32xf32>
    %cst_66 = arith.constant dense<0.000000e+00> : vector<8x8xf32>
    %141 = tpu.matmul %138, %139, %cst_66 {dimension_numbers = #tpu.dot_dimension_numbers<[1], [1], [0], [0], [0, 0, 1, 0], [], []>} : vector<8x32xf32>, vector<8x32xf32>, vector<8x8xf32> -> vector<8x8xf32>
    %cst_67 = arith.constant 0.176776692 : f32
    %142 = vector.broadcast %cst_67 : f32 to vector<8x8xf32>
    %143 = arith.mulf %141, %142 : vector<8x8xf32>
    %cst_68 = arith.constant dense<0xFF800000> : vector<8xf32>
    %144 = vector.multi_reduction <maximumf>, %143, %cst_68 [1] : vector<8x8xf32> to vector<8xf32>
    %145 = vector.shape_cast %144 : vector<8xf32> to vector<8x1xf32>
    %146 = vector.broadcast %145 : vector<8x1xf32> to vector<8x8xf32>
    %147 = arith.subf %143, %146 : vector<8x8xf32>
    %148 = math.exp %147 : vector<8x8xf32>
    %149 = arith.mulf %148, %99 : vector<8x8xf32>
    %cst_69 = arith.constant dense<0.000000e+00> : vector<8xf32>
    %150 = vector.multi_reduction <add>, %149, %cst_69 [1] : vector<8x8xf32> to vector<8xf32>
    %151 = vector.shape_cast %150 : vector<8xf32> to vector<8x1xf32>
    %152 = tpu.reciprocal %151 {approx = true} : vector<8x1xf32> -> vector<8x1xf32>
    %153 = vector.broadcast %152 : vector<8x1xf32> to vector<8x8xf32>
    %154 = arith.mulf %149, %153 : vector<8x8xf32>
    %cst_70 = arith.constant dense<0.000000e+00> : vector<8x32xf32>
    %155 = tpu.matmul %154, %140, %cst_70 {dimension_numbers = #tpu.dot_dimension_numbers<[1], [0], [0], [1], [0, 0, 1, 1], [], []>} : vector<8x8xf32>, vector<8x32xf32>, vector<8x32xf32> -> vector<8x32xf32>
    %c0_71 = arith.constant 0 : index
    %c64_72 = arith.constant 64 : index
    %156 = vector.load %arg6[%c0_71, %c64_72] : memref<8x128xf32, #tpu.memory_space<vmem>>, vector<8x32xf32>
    tpu.vector_store %arg6[%c0_71, %c64_72], %155 {strides = array<i32>} : memref<8x128xf32, #tpu.memory_space<vmem>>, vector<8x32xf32>,
    %157 = vector.extract_strided_slice %91 {offsets = [0, 96], sizes = [8, 32], strides = [1, 1]} : vector<8x128xf32> to vector<8x32xf32>
    %158 = vector.extract_strided_slice %93 {offsets = [0, 96], sizes = [8, 32], strides = [1, 1]} : vector<8x128xf32> to vector<8x32xf32>
    %159 = vector.extract_strided_slice %95 {offsets = [0, 96], sizes = [8, 32], strides = [1, 1]} : vector<8x128xf32> to vector<8x32xf32>
    %cst_73 = arith.constant dense<0.000000e+00> : vector<8x8xf32>
    %160 = tpu.matmul %157, %158, %cst_73 {dimension_numbers = #tpu.dot_dimension_numbers<[1], [1], [0], [0], [0, 0, 1, 0], [], []>} : vector<8x32xf32>, vector<8x32xf32>, vector<8x8xf32> -> vector<8x8xf32>
    %cst_74 = arith.constant 0.176776692 : f32
    %161 = vector.broadcast %cst_74 : f32 to vector<8x8xf32>
    %162 = arith.mulf %160, %161 : vector<8x8xf32>
    %cst_75 = arith.constant dense<0xFF800000> : vector<8xf32>
    %163 = vector.multi_reduction <maximumf>, %162, %cst_75 [1] : vector<8x8xf32> to vector<8xf32>
    %164 = vector.shape_cast %163 : vector<8xf32> to vector<8x1xf32>
    %165 = vector.broadcast %164 : vector<8x1xf32> to vector<8x8xf32>
    %166 = arith.subf %162, %165 : vector<8x8xf32>
    %167 = math.exp %166 : vector<8x8xf32>
    %168 = arith.mulf %167, %99 : vector<8x8xf32>
    %cst_76 = arith.constant dense<0.000000e+00> : vector<8xf32>
    %169 = vector.multi_reduction <add>, %168, %cst_76 [1] : vector<8x8xf32> to vector<8xf32>
    %170 = vector.shape_cast %169 : vector<8xf32> to vector<8x1xf32>
    %171 = tpu.reciprocal %170 {approx = true} : vector<8x1xf32> -> vector<8x1xf32>
    %172 = vector.broadcast %171 : vector<8x1xf32> to vector<8x8xf32>
    %173 = arith.mulf %168, %172 : vector<8x8xf32>
    %cst_77 = arith.constant dense<0.000000e+00> : vector<8x32xf32>
    %174 = tpu.matmul %173, %159, %cst_77 {dimension_numbers = #tpu.dot_dimension_numbers<[1], [0], [0], [1], [0, 0, 1, 1], [], []>} : vector<8x8xf32>, vector<8x32xf32>, vector<8x32xf32> -> vector<8x32xf32>
    %c0_78 = arith.constant 0 : index
    %c96_79 = arith.constant 96 : index
    %175 = vector.load %arg6[%c0_78, %c96_79] : memref<8x128xf32, #tpu.memory_space<vmem>>, vector<8x32xf32>
    tpu.vector_store %arg6[%c0_78, %c96_79], %174 {strides = array<i32>} : memref<8x128xf32, #tpu.memory_space<vmem>>, vector<8x32xf32>,
    %c0_80 = arith.constant 0 : index
    %c0_81 = arith.constant 0 : index
    %176 = vector.load %arg6[%c0_80, %c0_81] : memref<8x128xf32, #tpu.memory_space<vmem>>, vector<8x128xf32>
    %c1_82 = arith.constant 1 : index
    %c0_83 = arith.constant 0 : index
    %c0_84 = arith.constant 0 : index
    %177 = vector.load %arg5[%c1_82, %c0_83, %c0_84] : memref<3x8x128xf32, #tpu.memory_space<vmem>>, vector<1x8x128xf32>
    %178 = vector.shape_cast %177 : vector<1x8x128xf32> to vector<8x128xf32>
    %179 = vector.shape_cast %176 : vector<8x128xf32> to vector<1x8x128xf32>
    tpu.vector_store %arg5[%c1_82, %c0_83, %c0_84], %179 {strides = array<i32>} : memref<3x8x128xf32, #tpu.memory_space<vmem>>, vector<1x8x128xf32>,
    %c2_85 = arith.constant 2 : index
    %c0_86 = arith.constant 0 : index
    %c0_87 = arith.constant 0 : index
    %180 = vector.load %arg1[%c2_85, %c0_86, %c0_87] : memref<3x8x128xf32, #tpu.memory_space<vmem>>, vector<1x8x128xf32>
    %181 = vector.shape_cast %180 : vector<1x8x128xf32> to vector<8x128xf32>
    %c0_88 = arith.constant 0 : index
    %c0_89 = arith.constant 0 : index
    %c0_90 = arith.constant 0 : index
    %182 = vector.load %arg2[%c0_88, %c0_89, %c0_90] : memref<3x8x128xf32, #tpu.memory_space<vmem>>, vector<1x8x128xf32>
    %183 = vector.shape_cast %182 : vector<1x8x128xf32> to vector<8x128xf32>
    %c0_91 = arith.constant 0 : index
    %c0_92 = arith.constant 0 : index
    %c0_93 = arith.constant 0 : index
    %184 = vector.load %arg3[%c0_91, %c0_92, %c0_93] : memref<3x8x128xf32, #tpu.memory_space<vmem>>, vector<1x8x128xf32>
    %185 = vector.shape_cast %184 : vector<1x8x128xf32> to vector<8x128xf32>
    %c2_94 = arith.constant 2 : index
    %c0_95 = arith.constant 0 : index
    %c0_96 = arith.constant 0 : index
    %186 = vector.load %arg4[%c2_94, %c0_95, %c0_96] : memref<3x8x8xf32, #tpu.memory_space<vmem>>, vector<1x8x8xf32>
    %187 = vector.shape_cast %186 : vector<1x8x8xf32> to vector<8x8xf32>
    %cst_97 = arith.constant 9.99999993E-9 : f32
    %188 = vector.broadcast %cst_97 : f32 to vector<8x8xf32>
    %189 = arith.addf %187, %188 : vector<8x8xf32>
    %190 = vector.extract_strided_slice %181 {offsets = [0, 0], sizes = [8, 32], strides = [1, 1]} : vector<8x128xf32> to vector<8x32xf32>
    %191 = vector.extract_strided_slice %183 {offsets = [0, 0], sizes = [8, 32], strides = [1, 1]} : vector<8x128xf32> to vector<8x32xf32>
    %192 = vector.extract_strided_slice %185 {offsets = [0, 0], sizes = [8, 32], strides = [1, 1]} : vector<8x128xf32> to vector<8x32xf32>
    %cst_98 = arith.constant dense<0.000000e+00> : vector<8x8xf32>
    %193 = tpu.matmul %190, %191, %cst_98 {dimension_numbers = #tpu.dot_dimension_numbers<[1], [1], [0], [0], [0, 0, 1, 0], [], []>} : vector<8x32xf32>, vector<8x32xf32>, vector<8x8xf32> -> vector<8x8xf32>
    %cst_99 = arith.constant 0.176776692 : f32
    %194 = vector.broadcast %cst_99 : f32 to vector<8x8xf32>
    %195 = arith.mulf %193, %194 : vector<8x8xf32>
    %cst_100 = arith.constant dense<0xFF800000> : vector<8xf32>
    %196 = vector.multi_reduction <maximumf>, %195, %cst_100 [1] : vector<8x8xf32> to vector<8xf32>
    %197 = vector.shape_cast %196 : vector<8xf32> to vector<8x1xf32>
    %198 = vector.broadcast %197 : vector<8x1xf32> to vector<8x8xf32>
    %199 = arith.subf %195, %198 : vector<8x8xf32>
    %200 = math.exp %199 : vector<8x8xf32>
    %201 = arith.mulf %200, %189 : vector<8x8xf32>
    %cst_101 = arith.constant dense<0.000000e+00> : vector<8xf32>
    %202 = vector.multi_reduction <add>, %201, %cst_101 [1] : vector<8x8xf32> to vector<8xf32>
    %203 = vector.shape_cast %202 : vector<8xf32> to vector<8x1xf32>
    %204 = tpu.reciprocal %203 {approx = true} : vector<8x1xf32> -> vector<8x1xf32>
    %205 = vector.broadcast %204 : vector<8x1xf32> to vector<8x8xf32>
    %206 = arith.mulf %201, %205 : vector<8x8xf32>
    %cst_102 = arith.constant dense<0.000000e+00> : vector<8x32xf32>
    %207 = tpu.matmul %206, %192, %cst_102 {dimension_numbers = #tpu.dot_dimension_numbers<[1], [0], [0], [1], [0, 0, 1, 1], [], []>} : vector<8x8xf32>, vector<8x32xf32>, vector<8x32xf32> -> vector<8x32xf32>
    %c0_103 = arith.constant 0 : index
    %c0_104 = arith.constant 0 : index
    %208 = vector.load %arg6[%c0_103, %c0_104] : memref<8x128xf32, #tpu.memory_space<vmem>>, vector<8x32xf32>
    tpu.vector_store %arg6[%c0_103, %c0_104], %207 {strides = array<i32>} : memref<8x128xf32, #tpu.memory_space<vmem>>, vector<8x32xf32>,
    %209 = vector.extract_strided_slice %181 {offsets = [0, 32], sizes = [8, 32], strides = [1, 1]} : vector<8x128xf32> to vector<8x32xf32>
    %210 = vector.extract_strided_slice %183 {offsets = [0, 32], sizes = [8, 32], strides = [1, 1]} : vector<8x128xf32> to vector<8x32xf32>
    %211 = vector.extract_strided_slice %185 {offsets = [0, 32], sizes = [8, 32], strides = [1, 1]} : vector<8x128xf32> to vector<8x32xf32>
    %cst_105 = arith.constant dense<0.000000e+00> : vector<8x8xf32>
    %212 = tpu.matmul %209, %210, %cst_105 {dimension_numbers = #tpu.dot_dimension_numbers<[1], [1], [0], [0], [0, 0, 1, 0], [], []>} : vector<8x32xf32>, vector<8x32xf32>, vector<8x8xf32> -> vector<8x8xf32>
    %cst_106 = arith.constant 0.176776692 : f32
    %213 = vector.broadcast %cst_106 : f32 to vector<8x8xf32>
    %214 = arith.mulf %212, %213 : vector<8x8xf32>
    %cst_107 = arith.constant dense<0xFF800000> : vector<8xf32>
    %215 = vector.multi_reduction <maximumf>, %214, %cst_107 [1] : vector<8x8xf32> to vector<8xf32>
    %216 = vector.shape_cast %215 : vector<8xf32> to vector<8x1xf32>
    %217 = vector.broadcast %216 : vector<8x1xf32> to vector<8x8xf32>
    %218 = arith.subf %214, %217 : vector<8x8xf32>
    %219 = math.exp %218 : vector<8x8xf32>
    %220 = arith.mulf %219, %189 : vector<8x8xf32>
    %cst_108 = arith.constant dense<0.000000e+00> : vector<8xf32>
    %221 = vector.multi_reduction <add>, %220, %cst_108 [1] : vector<8x8xf32> to vector<8xf32>
    %222 = vector.shape_cast %221 : vector<8xf32> to vector<8x1xf32>
    %223 = tpu.reciprocal %222 {approx = true} : vector<8x1xf32> -> vector<8x1xf32>
    %224 = vector.broadcast %223 : vector<8x1xf32> to vector<8x8xf32>
    %225 = arith.mulf %220, %224 : vector<8x8xf32>
    %cst_109 = arith.constant dense<0.000000e+00> : vector<8x32xf32>
    %226 = tpu.matmul %225, %211, %cst_109 {dimension_numbers = #tpu.dot_dimension_numbers<[1], [0], [0], [1], [0, 0, 1, 1], [], []>} : vector<8x8xf32>, vector<8x32xf32>, vector<8x32xf32> -> vector<8x32xf32>
    %c0_110 = arith.constant 0 : index
    %c32_111 = arith.constant 32 : index
    %227 = vector.load %arg6[%c0_110, %c32_111] : memref<8x128xf32, #tpu.memory_space<vmem>>, vector<8x32xf32>
    tpu.vector_store %arg6[%c0_110, %c32_111], %226 {strides = array<i32>} : memref<8x128xf32, #tpu.memory_space<vmem>>, vector<8x32xf32>,
    %228 = vector.extract_strided_slice %181 {offsets = [0, 64], sizes = [8, 32], strides = [1, 1]} : vector<8x128xf32> to vector<8x32xf32>
    %229 = vector.extract_strided_slice %183 {offsets = [0, 64], sizes = [8, 32], strides = [1, 1]} : vector<8x128xf32> to vector<8x32xf32>
    %230 = vector.extract_strided_slice %185 {offsets = [0, 64], sizes = [8, 32], strides = [1, 1]} : vector<8x128xf32> to vector<8x32xf32>
    %cst_112 = arith.constant dense<0.000000e+00> : vector<8x8xf32>
    %231 = tpu.matmul %228, %229, %cst_112 {dimension_numbers = #tpu.dot_dimension_numbers<[1], [1], [0], [0], [0, 0, 1, 0], [], []>} : vector<8x32xf32>, vector<8x32xf32>, vector<8x8xf32> -> vector<8x8xf32>
    %cst_113 = arith.constant 0.176776692 : f32
    %232 = vector.broadcast %cst_113 : f32 to vector<8x8xf32>
    %233 = arith.mulf %231, %232 : vector<8x8xf32>
    %cst_114 = arith.constant dense<0xFF800000> : vector<8xf32>
    %234 = vector.multi_reduction <maximumf>, %233, %cst_114 [1] : vector<8x8xf32> to vector<8xf32>
    %235 = vector.shape_cast %234 : vector<8xf32> to vector<8x1xf32>
    %236 = vector.broadcast %235 : vector<8x1xf32> to vector<8x8xf32>
    %237 = arith.subf %233, %236 : vector<8x8xf32>
    %238 = math.exp %237 : vector<8x8xf32>
    %239 = arith.mulf %238, %189 : vector<8x8xf32>
    %cst_115 = arith.constant dense<0.000000e+00> : vector<8xf32>
    %240 = vector.multi_reduction <add>, %239, %cst_115 [1] : vector<8x8xf32> to vector<8xf32>
    %241 = vector.shape_cast %240 : vector<8xf32> to vector<8x1xf32>
    %242 = tpu.reciprocal %241 {approx = true} : vector<8x1xf32> -> vector<8x1xf32>
    %243 = vector.broadcast %242 : vector<8x1xf32> to vector<8x8xf32>
    %244 = arith.mulf %239, %243 : vector<8x8xf32>
    %cst_116 = arith.constant dense<0.000000e+00> : vector<8x32xf32>
    %245 = tpu.matmul %244, %230, %cst_116 {dimension_numbers = #tpu.dot_dimension_numbers<[1], [0], [0], [1], [0, 0, 1, 1], [], []>} : vector<8x8xf32>, vector<8x32xf32>, vector<8x32xf32> -> vector<8x32xf32>
    %c0_117 = arith.constant 0 : index
    %c64_118 = arith.constant 64 : index
    %246 = vector.load %arg6[%c0_117, %c64_118] : memref<8x128xf32, #tpu.memory_space<vmem>>, vector<8x32xf32>
    tpu.vector_store %arg6[%c0_117, %c64_118], %245 {strides = array<i32>} : memref<8x128xf32, #tpu.memory_space<vmem>>, vector<8x32xf32>,
    %247 = vector.extract_strided_slice %181 {offsets = [0, 96], sizes = [8, 32], strides = [1, 1]} : vector<8x128xf32> to vector<8x32xf32>
    %248 = vector.extract_strided_slice %183 {offsets = [0, 96], sizes = [8, 32], strides = [1, 1]} : vector<8x128xf32> to vector<8x32xf32>
    %249 = vector.extract_strided_slice %185 {offsets = [0, 96], sizes = [8, 32], strides = [1, 1]} : vector<8x128xf32> to vector<8x32xf32>
    %cst_119 = arith.constant dense<0.000000e+00> : vector<8x8xf32>
    %250 = tpu.matmul %247, %248, %cst_119 {dimension_numbers = #tpu.dot_dimension_numbers<[1], [1], [0], [0], [0, 0, 1, 0], [], []>} : vector<8x32xf32>, vector<8x32xf32>, vector<8x8xf32> -> vector<8x8xf32>
    %cst_120 = arith.constant 0.176776692 : f32
    %251 = vector.broadcast %cst_120 : f32 to vector<8x8xf32>
    %252 = arith.mulf %250, %251 : vector<8x8xf32>
    %cst_121 = arith.constant dense<0xFF800000> : vector<8xf32>
    %253 = vector.multi_reduction <maximumf>, %252, %cst_121 [1] : vector<8x8xf32> to vector<8xf32>
    %254 = vector.shape_cast %253 : vector<8xf32> to vector<8x1xf32>
    %255 = vector.broadcast %254 : vector<8x1xf32> to vector<8x8xf32>
    %256 = arith.subf %252, %255 : vector<8x8xf32>
    %257 = math.exp %256 : vector<8x8xf32>
    %258 = arith.mulf %257, %189 : vector<8x8xf32>
    %cst_122 = arith.constant dense<0.000000e+00> : vector<8xf32>
    %259 = vector.multi_reduction <add>, %258, %cst_122 [1] : vector<8x8xf32> to vector<8xf32>
    %260 = vector.shape_cast %259 : vector<8xf32> to vector<8x1xf32>
    %261 = tpu.reciprocal %260 {approx = true} : vector<8x1xf32> -> vector<8x1xf32>
    %262 = vector.broadcast %261 : vector<8x1xf32> to vector<8x8xf32>
    %263 = arith.mulf %258, %262 : vector<8x8xf32>
    %cst_123 = arith.constant dense<0.000000e+00> : vector<8x32xf32>
    %264 = tpu.matmul %263, %249, %cst_123 {dimension_numbers = #tpu.dot_dimension_numbers<[1], [0], [0], [1], [0, 0, 1, 1], [], []>} : vector<8x8xf32>, vector<8x32xf32>, vector<8x32xf32> -> vector<8x32xf32>
    %c0_124 = arith.constant 0 : index
    %c96_125 = arith.constant 96 : index
    %265 = vector.load %arg6[%c0_124, %c96_125] : memref<8x128xf32, #tpu.memory_space<vmem>>, vector<8x32xf32>
    tpu.vector_store %arg6[%c0_124, %c96_125], %264 {strides = array<i32>} : memref<8x128xf32, #tpu.memory_space<vmem>>, vector<8x32xf32>,
    %c0_126 = arith.constant 0 : index
    %c0_127 = arith.constant 0 : index
    %266 = vector.load %arg6[%c0_126, %c0_127] : memref<8x128xf32, #tpu.memory_space<vmem>>, vector<8x128xf32>
    %c2_128 = arith.constant 2 : index
    %c0_129 = arith.constant 0 : index
    %c0_130 = arith.constant 0 : index
    %267 = vector.load %arg5[%c2_128, %c0_129, %c0_130] : memref<3x8x128xf32, #tpu.memory_space<vmem>>, vector<1x8x128xf32>
    %268 = vector.shape_cast %267 : vector<1x8x128xf32> to vector<8x128xf32>
    %269 = vector.shape_cast %266 : vector<8x128xf32> to vector<1x8x128xf32>
    tpu.vector_store %arg5[%c2_128, %c0_129, %c0_130], %269 {strides = array<i32>} : memref<3x8x128xf32, #tpu.memory_space<vmem>>, vector<1x8x128xf32>,
    return
  }
  func.func @transform_0(%arg0: i32) -> (i32, i32, i32) {
    %c0_i32 = arith.constant 0 : i32
    %c0_i32_0 = arith.constant 0 : i32
    %c0_i32_1 = arith.constant 0 : i32
    return %arg0, %c0_i32, %c0_i32_0 : i32, i32, i32
  }
  func.func @transform_1(%arg0: i32) -> (i32, i32, i32) {
    %c0_i32 = arith.constant 0 : i32
    %c0_i32_0 = arith.constant 0 : i32
    %c0_i32_1 = arith.constant 0 : i32
    return %arg0, %c0_i32, %c0_i32_0 : i32, i32, i32
  }
  func.func @transform_2(%arg0: i32) -> (i32, i32, i32) {
    %c0_i32 = arith.constant 0 : i32
    %c0_i32_0 = arith.constant 0 : i32
    %c0_i32_1 = arith.constant 0 : i32
    return %arg0, %c0_i32, %c0_i32_0 : i32, i32, i32
  }
  func.func @transform_3(%arg0: i32) -> (i32, i32, i32) {
    %c0_i32 = arith.constant 0 : i32
    %c0_i32_0 = arith.constant 0 : i32
    %c0_i32_1 = arith.constant 0 : i32
    return %arg0, %c0_i32, %c0_i32_0 : i32, i32, i32
  }
  func.func @transform_4(%arg0: i32) -> (i32, i32, i32) {
    %c0_i32 = arith.constant 0 : i32
    %c0_i32_0 = arith.constant 0 : i32
    %c0_i32_1 = arith.constant 0 : i32
    return %arg0, %c0_i32, %c0_i32_0 : i32, i32, i32
  }
}

</mosaic_0001>

<bundles_post_ra>
// kernel: tpu_custom_call.1
= control target key start
LH: loop header
LB: loop body
LE: loop exit
PB: predicated region body
PF: predicated region fallthrough
CT: control target
= control target key end

     0   :  { %s3726_s0 = inlined_call_operand.hbm [shape: f32[6,8,128], index: 0, kind: input, shape index: {}]   ;;  %s3727_s1 = inlined_call_operand.hbm [shape: f32[6,8,128], index: 1, kind: input, shape index: {}]   ;;  %s3728_s2 = inlined_call_operand.hbm [shape: f32[6,8,128], index: 2, kind: input, shape index: {}]   ;;  %s3729_s3 = inlined_call_operand.hbm [shape: f32[6,8,8], index: 3, kind: input, shape index: {}]   ;;  %s3730_s4 = inlined_call_operand.hbm [shape: f32[6,8,128], index: 4, kind: output, shape index: {}]  }
   0x1   :  { %3740 = sst [smem:[#allocation19_spill]] %s3726_s0 }
   0x2   :  { %3741 = sst [smem:[#allocation20_spill]] %s3727_s1 }
   0x3   :  { %9 = vsyncpa [#allocation4], 0 }
   0x4   :  { %11 = vsyncpa [#allocation4 + $0x1], 0 }
   0x5   :  { %12 = vsyncpa [#allocation7], 0 }
   0x6   :  { %14 = vsyncpa [#allocation7 + $0x1], 0 }
   0x7   :  { %15 = vsyncpa [#allocation10], 0 }
   0x8   :  { %17 = vsyncpa [#allocation10 + $0x1], 0 }
   0x9   :  { %18 = vsyncpa [#allocation5], 0 }
   0xa   :  { %20 = vsyncpa [#allocation5 + $0x1], 0  ;;  %s3145_s15 = smov 0   ;;  %s3147_s16 = smov 0  }
   0xb   :  { %s3149_s17 = smov 0   ;;  %s3151_s18 = smov 0  }
   0xc LB: > { %3742 = sst [smem:[#allocation16_spill]] %s3100_s17  ;;  %s3166_s19 = sadd.s32 4294967295, %s3104_s18   ;;  %s3104_s18 = sphi %s3151_s18, %s3761_s18   ;;  %s3100_s17 = sphi %s3149_s17, %s3763_s17   ;;  %s3096_s16 = sphi %s3147_s16, %s3765_s16   ;;  %s3092_s15 = sphi %s3145_s15, %s3764_s15  }
   0xd   : > { %s2567_s20 = sadd.s32 4294967294, %s3104_s18   ;;  %s3170_s21 = sadd.s32 1, %s3104_s18  }
   0xe   : > { %3743 = sst [smem:[#allocation17_spill]] %s3170_s21  ;;  %s33_s22 = sadd.s32 1, %s3100_s17 }
   0xf   : > { %s30_s23 = ssub.s32 %s3104_s18, %s3170_s21  ;;  %p40_p0 = scmp.ne.s32.totalorder %s3100_s17, %s3096_s16 }
  0x10   : > { %p31_p1 = scmp.eq.s32.totalorder %s30_s23, 0  ;;  %p41_p2 = scmp.eq.s32.totalorder %s3104_s18, 0 }
  0x11   : > { %p46_p3 = scmp.ne.s32.totalorder %s3096_s16, %s3092_s15  ;;  %p47_p4 = scmp.eq.s32.totalorder %s3166_s19, 0 }
  0x12   : > { %s3182_s24 = scalar_select %p31_p1, %s3100_s17, %s33_s22  }
  0x13   : > { %p42_p5 = por %p41_p2, %p40_p0  ;;  %p3184_p6 = por %p47_p4, %p46_p3 }
  0x14   : > { %3744 = sst [smem:[#allocation18_spill]] %s3182_s24  ;;  %p148_p7 = scmp.eq.s32.totalorder %s3166_s19, 1 }
  0x15   : > { %s3745_s25 = scalar_select %p3184_p6, 1, 0 }
  0x16   : > { %p154_p8 = scmp.eq.s32.totalorder %s2567_s20, 1  ;;  %p2829_p10 = scmp.lt.s32.totalorder %s3104_s18, 2 }
  0x17   : > { %p3191_p11 = por %p148_p7, %p40_p0  ;;  %s3200_s28 = sand.u32 1, %s3100_s17  }
  0x18   : > { %p3195_p12 = por %p154_p8, %p46_p3  ;;  %s3203_s29 = smul.u32 384, %s3104_s18 }
  0x19   : > { %s3746_s26 = scalar_select %p3191_p11, 1, 0 }
  0x1a   : > { %s3747_s27 = scalar_select %p3195_p12, 1, 0 }
  0x1b   : > { %s3206_s30 = smul.u32 24, %s3200_s28  ;;  %p3208_p13 = pnand %p2829_p10, %p42_p5 }
  0x1c   : > { %s195_s6 = sand.u32 1, %s3104_s18   ;;  %s3749_s1 = sld [smem:[#allocation20_spill]] }
  0x1d   : > { %s199_s10 = scalar_lea.vmem [#allocation6], %s3206_s30  ;;  %s3223_s12 = scalar_lea.sflag [#allocation7], %s195_s6 }
  0x1e   : > { %s206_s11 = sshll.u32 %s199_s10, 4  ;;  %p3229_p2 = pneg %p3208_p13  ;;  %s3220_s11 = int_to_ptr.vmem [resolvable:$true] %s206_s11 }
  0x22   : > { %s3217_s9 = scalar_lea.hbm %s3749_s1, %s3203_s29  ;;  %s2925_s23 = scalar_lea.hbm %s3749_s1, 768 }
  0x23   : > { %s2920_s13 = scalar_lea.hbm %s3217_s9, 384  ;;  %p2926_p5 = scmp.lt.s32.totalorder %s3217_s9, %s3749_s1 }
  0x24   : > { %p2921_p1 = scmp.ne.s32.totalorder %s3217_s9, %s2920_s13  ;;  %p2927_p7 = scmp.lt.s32.totalorder %s2925_s23, %s2920_s13 }
  0x26   : > { %p2923_p3 = pnand %p3229_p2, %p2921_p1  ;;  %p2928_p8 = por %p2927_p7, %p2926_p5 }
  0x28   : > { %p2924_p4 = pneg %p2923_p3 }
  0x2a   : > { %p2929_p10 = pnand %p2928_p8, %p2924_p4 }
  0x2c   : > { %2932 = shalt.err (!%p2929_p10)
}
  0x2d   : > { %s2933_s6 = scalar_lea.vmem %s3220_s11, 384  ;;  %s3106_s10 = smov [#allocation6]  }
  0x2e   : > { %p2934_p9 = scmp.ne.s32.totalorder %s3220_s11, %s2933_s6  ;;  %s2938_s20 = sshll.u32 %s3106_s10, 4  ;;  %s2939_s20 = int_to_ptr.vmem [resolvable:$false] %s2938_s20 }
  0x2f   : > { %s2940_s22 = scalar_lea.vmem %s2939_s20, 768  ;;  %p2941_p0 = scmp.lt.s32.totalorder %s3220_s11, %s2939_s20 }
  0x30   : > { %p2936_p1 = pnand %p2934_p9, %p3229_p2  ;;  %p2942_p12 = scmp.lt.s32.totalorder %s2940_s22, %s2933_s6 }
  0x32   : > { %p2937_p3 = pneg %p2936_p1  ;;  %p2943_p11 = por %p2942_p12, %p2941_p0 }
  0x34   : > { %p2944_p6 = pnand %p2943_p11, %p2937_p3 }
  0x36   : > { %2947 = shalt.err (!%p2944_p6)
}
  0x37   : > { %s3733_s13 = smov 128   ;;  %s3735_s23 = smov 8  }
  0x38   : > { %2818 = dma.hbm_to_vmem [thread:$0]  (!%p3208_p13), %s3217_s9, 384, %s3220_s11, %s3223_s12, %s3733_s13, %s3733_s13, %s3735_s23  }
  0x39   : > { %p256_p9 = scmp.lt.s32.totalorder %s3104_s18, 3  ;;  %s3751_s0 = sld [smem:[#allocation19_spill]] }
  0x3a   : > { %p3752_p6 = scmp.ge.s32.totalorder %s3104_s18, 1  ;;  %s178_s20 = scalar_lea.vmem [#allocation3], %s3206_s30 }
  0x3b   : > { %s185_s22 = sshll.u32 %s178_s20, 4  ;;  %s175_s1 = scalar_lea.sflag [#allocation4], %s3200_s28  ;;  %s3269_s22 = int_to_ptr.vmem [resolvable:$true] %s185_s22 }
  0x3c   : > { %p3264_p11 = pnand %p3752_p6, %p256_p9 }
  0x3e   : > { %s3753_s10 = scalar_select %p3264_p11, 1, 0 }
  0x3f   : > { %s3260_s6 = scalar_lea.hbm %s3751_s0, %s3203_s29  ;;  %s2953_s8 = scalar_lea.hbm %s3751_s0, 768 }
  0x40   : > { %s2948_s9 = scalar_lea.hbm %s3260_s6, 384  ;;  %p2954_p5 = scmp.lt.s32.totalorder %s3260_s6, %s3751_s0 }
  0x41   : > { %p2949_p12 = scmp.ne.s32.totalorder %s3260_s6, %s2948_s9  ;;  %p2955_p7 = scmp.lt.s32.totalorder %s2953_s8, %s2948_s9 }
  0x43   : > { %p2951_p0 = pnand %p2949_p12, %p3229_p2  ;;  %p2956_p8 = por %p2955_p7, %p2954_p5 }
  0x45   : > { %p2952_p4 = pneg %p2951_p0 }
  0x47   : > { %p2957_p10 = pnand %p2956_p8, %p2952_p4 }
  0x49   : > { %2960 = shalt.err (!%p2957_p10)
}
  0x4a   : > { %s2961_s20 = scalar_lea.vmem %s3269_s22, 384  ;;  %s3109_s24 = smov [#allocation3]  }
  0x4b   : > { %p2962_p1 = scmp.ne.s32.totalorder %s3269_s22, %s2961_s20  ;;  %s2966_s11 = sshll.u32 %s3109_s24, 4  ;;  %s2967_s11 = int_to_ptr.vmem [resolvable:$false] %s2966_s11 }
  0x4c   : > { %s2968_s7 = scalar_lea.vmem %s2967_s11, 768  ;;  %p2969_p6 = scmp.lt.s32.totalorder %s3269_s22, %s2967_s11 }
  0x4d   : > { %p2964_p3 = pnand %p2962_p1, %p3229_p2  ;;  %p2970_p12 = scmp.lt.s32.totalorder %s2968_s7, %s2961_s20 }
  0x4f   : > { %p2965_p9 = pneg %p2964_p3  ;;  %p2971_p0 = por %p2970_p12, %p2969_p6 }
  0x51   : > { %p2972_p11 = pnand %p2971_p0, %p2965_p9 }
  0x53   : > { %2975 = shalt.err (!%p2972_p11)
}
  0x54   : > { %s3754_s13 = smov 8   ;;  %s3755_s23 = smov 128  }
  0x55   : > { %2815 = dma.hbm_to_vmem [thread:$0]  (!%p3208_p13), %s3260_s6, 384, %s3269_s22, %s175_s1, %s3755_s23, %s3755_s23, %s3754_s13  }
  0x56   : > { %s3299_s8 = scalar_lea.hbm %s3728_s2, %s3203_s29  ;;  %s220_s20 = scalar_lea.vmem [#allocation8], %s3206_s30 }
  0x57   : > { %s227_s11 = sshll.u32 %s220_s20, 4  ;;  %s2976_s7 = scalar_lea.hbm %s3299_s8, 384  ;;  %s228_s11 = int_to_ptr.vmem [resolvable:$true] %s227_s11 }
  0x58   : > { %p2977_p11 = scmp.ne.s32.totalorder %s3299_s8, %s2976_s7  ;;  %s2981_s1 = scalar_lea.hbm %s3728_s2, 768 }
  0x59   : > { %p2982_p7 = scmp.lt.s32.totalorder %s3299_s8, %s3728_s2  ;;  %p2983_p8 = scmp.lt.s32.totalorder %s2981_s1, %s2976_s7 }
  0x5a   : > { %p2979_p4 = pnand %p2977_p11, %p3229_p2 }
  0x5b   : > { %p2984_p10 = por %p2983_p8, %p2982_p7 }
  0x5c   : > { %p2980_p5 = pneg %p2979_p4 }
  0x5e   : > { %p2985_p1 = pnand %p2984_p10, %p2980_p5 }
  0x60   : > { %2988 = shalt.err (!%p2985_p1)
}
  0x61   : > { %s2989_s9 = scalar_lea.vmem %s228_s11, 384  ;;  %s3110_s24 = smov [#allocation8]  }
  0x62   : > { %p2990_p3 = scmp.ne.s32.totalorder %s228_s11, %s2989_s9  ;;  %s2994_s20 = sshll.u32 %s3110_s24, 4  ;;  %s2995_s20 = int_to_ptr.vmem [resolvable:$false] %s2994_s20 }
  0x63   : > { %s2996_s21 = scalar_lea.vmem %s2995_s20, 768  ;;  %p2997_p12 = scmp.lt.s32.totalorder %s228_s11, %s2995_s20 }
  0x64   : > { %p2992_p9 = pnand %p2990_p3, %p3229_p2  ;;  %p2998_p0 = scmp.lt.s32.totalorder %s2996_s21, %s2989_s9 }
  0x66   : > { %p2993_p6 = pneg %p2992_p9  ;;  %p2999_p11 = por %p2998_p0, %p2997_p12 }
  0x68   : > { %p3000_p4 = pnand %p2999_p11, %p2993_p6 }
  0x6a   : > { %3003 = shalt.err (!%p3000_p4)
}
  0x6b   : > { %2821 = dma.hbm_to_vmem [thread:$0]  (!%p3208_p13), %s3299_s8, 384, %s228_s11, %s3223_s12, %s3755_s23, %s3755_s23, %s3754_s13  }
  0x6c   : > { %s3326_s7 = scalar_lea.hbm %s3729_s3, %s3203_s29  ;;  %s241_s21 = scalar_lea.vmem [#allocation9], %s3206_s30 }
  0x6d   : > { %s248_s1 = sshll.u32 %s241_s21, 4  ;;  %s238_s6 = scalar_lea.sflag [#allocation10], %s3200_s28  ;;  %s3329_s1 = int_to_ptr.vmem [resolvable:$true] %s248_s1 }
  0x6e   : > { %s3004_s22 = scalar_lea.hbm %s3326_s7, 384  ;;  %s3009_s8 = scalar_lea.hbm %s3729_s3, 768 }
  0x6f   : > { %p3005_p5 = scmp.ne.s32.totalorder %s3326_s7, %s3004_s22  ;;  %p3010_p10 = scmp.lt.s32.totalorder %s3326_s7, %s3729_s3 }
  0x70   : > { %p3011_p1 = scmp.lt.s32.totalorder %s3009_s8, %s3004_s22 }
  0x71   : > { %p3007_p7 = pnand %p3005_p5, %p3229_p2 }
  0x72   : > { %p3012_p3 = por %p3011_p1, %p3010_p10 }
  0x73   : > { %p3008_p8 = pneg %p3007_p7 }
  0x75   : > { %p3013_p9 = pnand %p3012_p3, %p3008_p8 }
  0x77   : > { %3016 = shalt.err (!%p3013_p9)
}
  0x78   : > { %s3017_s28 = scalar_lea.vmem %s3329_s1, 384  ;;  %s3111_s30 = smov [#allocation9]  }
  0x79   : > { %p3018_p6 = scmp.ne.s32.totalorder %s3329_s1, %s3017_s28  ;;  %s3022_s24 = sshll.u32 %s3111_s30, 4  ;;  %s3023_s24 = int_to_ptr.vmem [resolvable:$false] %s3022_s24 }
  0x7a   : > { %s3024_s20 = scalar_lea.vmem %s3023_s24, 768  ;;  %p3025_p11 = scmp.lt.s32.totalorder %s3329_s1, %s3023_s24 }
  0x7b   : > { %p3020_p12 = pnand %p3018_p6, %p3229_p2  ;;  %p3026_p4 = scmp.lt.s32.totalorder %s3024_s20, %s3017_s28 }
  0x7d   : > { %p3021_p0 = pneg %p3020_p12  ;;  %p3027_p5 = por %p3026_p4, %p3025_p11 }
  0x7f   : > { %p3028_p7 = pnand %p3027_p5, %p3021_p0 }
  0x81   : > { %3031 = shalt.err (!%p3028_p7)
}
  0x82   : > { %2824 = dma.hbm_to_vmem [thread:$0]  (!%p3208_p13), %s3326_s7, 384, %s3329_s1, %s238_s6, %s3755_s23, %s3755_s23, %s3754_s13  }
  0x83   : > { %p3756_p2 = scmp.ne.s32.totalorder %s3753_s10, 0 }
  0x84   : > { %s3358_s14 = sand.u32 (!%p3756_p2), 1, %s3096_s16   ;;  %p3757_p8 = scmp.ne.s32.totalorder (!%p3756_p2), %s3745_s25, 0 }
  0x85   : > { %260 = sbr.rel (%p3756_p2) target bundleno = 1588 (0x634), region = 36  ;;  %s263_s17 = scalar_lea.sflag (!%p3756_p2), [#allocation4], %s3358_s14 }
  0x86   : > { %s3361_s0 = smul.u32 (!%p3756_p2), 24, %s3358_s14 }
  0x88   : > { %s3365_s5 = scalar_lea.vmem (!%p3756_p2), [#allocation3], %s3361_s0 }
  0x8a   : > { %3075 = dma.done.wait (%p3757_p8), %s263_s17, 384  }
  0x8b   : > { %3077 = vsyncadd (%p3757_p8), %s263_s17, 4294966912  ;;  %s271_s10 = sand.u32 1, %s3166_s19   ;;  %s3373_s23 = scalar_lea.vmem [#allocation6], %s3361_s0 }
  0x8c   : > { %s272_s13 = scalar_lea.sflag [#allocation7], %s271_s10 }
  0x8d   : > { %3079 = dma.done.wait (%p3757_p8), %s272_s13, 768  }
  0x8e   : > { %3081 = vsyncadd (%p3757_p8), %s272_s13, 4294966528  ;;  %s3380_s7 = scalar_lea.vmem [#allocation8], %s3361_s0  ;;  %s290_s21 = scalar_lea.sflag [#allocation10], %s3358_s14 }
  0x8f   : > { %s3384_s1 = scalar_lea.vmem [#allocation9], %s3361_s0 }
  0x90   : > { %3083 = dma.done.wait (%p3757_p8), %s290_s21, 384  }
  0x91   : > { %3085 = vsyncadd (%p3757_p8), %s290_s21, 4294966912  ;;  %v3112_v0 = vmov 0.0   ;;  %vm3113_vm0 = vmmov 0   ;;  %vm345_vm1 = vcmask 261120   ;;  %v2575_v1 = vld [vmem:[%s3373_s23 + $0x8] sm:$0xff]  ;;  %v338_v2 = vld [vmem:[%s3365_s5] sm:$0xff] }
  0x92   : > { %2677 = vmatprep.subr.mxu0 %v3112_v0  ;;  %2679 = vmatprep.mubr.msk.f32.mxu0 %vm3113_vm0, %v3112_v0  ;;  %vm423_vm2 = vcmask 64512   ;;  %s3114_s25 = smov 96   ;;  %s3115_s6 = smov 64   ;;  %v2590_v7 = vld [vmem:[%s3373_s23 + $0x10] sm:$0xff]  ;;  %v2589_v8 = vld [vmem:[%s3365_s5 + $0x8] sm:$0xff]  ;;  %v3416_v9 = vld [vmem:[%s3373_s23] sm:$0xff] }
  0x93   : > { %2682 = vmatprep.subr.mxu1 %v3112_v0  ;;  %2684 = vmatprep.mubr.msk.f32.mxu1 %vm3113_vm0, %v3112_v0  ;;  %s3116_s22 = smov 32   ;;  %v343_v13 = vld [vmem:[%s3384_s1] sm:$0xff]  ;;  %v2576_v18 = vld [vmem:[%s3380_s7 + $0x8] sm:$0xff]  ;;  %vm682_vm3 = vcmask 523520   ;;  %vm855_vm4 = vcmask 785920   ;;  %vm1028_vm5 = vcmask 1048320  }
  0x94   : > { %2678 = vmatpush3.xpose.msk.msra.mxu0 %vm345_vm1, %v2575_v1  ;;  %512 = vrot.lane.b32.xlu1 %v2575_v1, %s3114_s25  ;;  %v3425_v14 = vadd.f32 1e-08, %v343_v13  ;;  %v2606_v19 = vld [vmem:[%s3365_s5 + $0x10] sm:$0xff]  ;;  %s332_s9 = scalar_lea.vmem [#allocation11], %s3361_s0  ;;  %s2628_s12 = smul.u32 384, %s3166_s19 }
  0x95   : > { %2692 = vmatprep.subr.mxu0 %v3112_v0  ;;  %2683 = vmatpush3.msra.mxu1 %v2576_v18  ;;  %s2428_s8 = sshll.u32 %s332_s9, 4  ;;  %s2415_s30 = scalar_lea.sflag [#allocation5], %s3358_s14  ;;  %s3683_s8 = int_to_ptr.vmem [resolvable:$true] %s2428_s8 }
  0x96   : > { %2687 = vmatprep.subr.mxu1 %v3112_v0  ;;  %s3681_s28 = scalar_lea.hbm %s3730_s4, %s2628_s12  ;;  %s3032_s24 = scalar_lea.vmem %s3683_s8, 384 }
  0x97   : > { %2680 = vmatmul.mubr.msk.f32.vlgmr.msra.gmra.mxu0 %vm345_vm1, %v338_v2  ;;  %p3033_p13 = scmp.ne.s32.totalorder %s3683_s8, %s3032_s24  ;;  %p3758_p10 = scmp.ne.s32.totalorder %s3746_s26, 0 }
  0x98   : > { %2694 = vmatprep.mubr.msk.f32.mxu0 %vm3113_vm0, %v3112_v0  ;;  %510 = vrot.lane.b32.xlu1 %v338_v2, %s3114_s25  ;;  %s3117_s19 = smov [#allocation11]  }
  0x99   : > { %p3034_p1 = pnand %p3033_p13, %p3758_p10  ;;  %s3036_s20 = sshll.u32 %s3117_s19, 4  ;;  %s3037_s20 = int_to_ptr.vmem [resolvable:$false] %s3036_s20 }
  0x9a   : > { %s3038_s0 = scalar_lea.vmem %s3037_s20, 768  ;;  %p3039_p9 = scmp.lt.s32.totalorder %s3683_s8, %s3037_s20 }
  0x9b   : > { %p3035_p3 = pneg %p3034_p1  ;;  %p3040_p6 = scmp.lt.s32.totalorder %s3038_s0, %s3032_s24 }
  0x9c   : > { %684 = vrot.lane.b32.xlu1 %v338_v2, %s3115_s6 }
  0x9d   : > { %p3041_p12 = por %p3040_p6, %p3039_p9 }
  0x9f   : > { %p3042_p0 = pnand %p3041_p12, %p3035_p3 }
  0xa0   : > { %859 = vrot.lane.b32.xlu1 %v2575_v1, %s3116_s22 }
  0xa4   : > { %857 = vrot.lane.b32.xlu1 %v338_v2, %s3116_s22 }
  0xa8   : > { %1206 = vrot.lane.b32.xlu1 %v2590_v7, %s3114_s25 }
  0xac   : > { %1204 = vrot.lane.b32.xlu1 %v2589_v8, %s3114_s25 }
  0xb0   : > { %1379 = vrot.lane.b32.xlu1 %v2590_v7, %s3115_s6 }
  0xb4   : > { %1551 = vrot.lane.b32.xlu1 %v2590_v7, %s3116_s22 }
  0xb8   : > { %1896 = vrot.lane.b32.xlu1 %v3416_v9, %s3114_s25 }
  0xbc   : > { %2069 = vrot.lane.b32.xlu1 %v3416_v9, %s3115_s6 }
  0xc0   : > { %2241 = vrot.lane.b32.xlu1 %v3416_v9, %s3116_s22 }
  0xc4   : > { %775 = vrot.lane.b32.xlu1 %v2576_v18, %s3115_s6 }
  0xc8   : > { %948 = vrot.lane.b32.xlu1 %v2576_v18, %s3116_s22 }
 0x106   : > { %v513_v20 = vpop.permute.xlu1 %512 }
 0x10a   : > { %v511_v21 = vpop.permute.xlu1 %510 }
 0x10e   : > { %v685_v23 = vpop.permute.xlu1 %684 }
 0x112   : > { %v860_v24 = vpop.permute.xlu1 %859 }
 0x116   : > { %v858_v27 = vpop.permute.xlu1 %857 }
 0x11a   : > { %v1207_v29 = vpop.permute.xlu1 %1206 }
 0x11e   : > { %v1205_v30 = vpop.permute.xlu1 %1204 }
 0x122   : > { %v1380_v31 = vpop.permute.xlu1 %1379 }
 0x126   : > { %v1552_v33 = vpop.permute.xlu1 %1551 }
 0x12a   : > { %v1897_v35 = vpop.permute.xlu1 %1896 }
 0x12e   : > { %v2070_v37 = vpop.permute.xlu1 %2069 }
 0x132   : > { %v2242_v39 = vpop.permute.xlu1 %2241 }
 0x157   : > { %v418_v3 = vpop.f32.mrf.mxu0 }
 0x158   : > { %v422_v4 = vmul.f32 0.17677669, %v418_v3 }
 0x159   : > { %v2681_v5 = vpop.f32.mrf.mxu0 }
 0x15a   : > { %v424_v6 = vsel %vm423_vm2, %v422_v4, -inf }
 0x15b   : > { %425 = vmax.xlane.f32.xlu0 %v424_v6 }
 0x1e4   : > { %v426_v10 = vpop.xlane.xlu0 %425 }
 0x1e5   : > { %v427_v11 = vsub.f32 %v422_v4, %v426_v10 }
 0x1e7   : > { %v428_v12 = vmul.f32 1.442695, %v427_v11 }
 0x1e9   : > { %2872 = vpow2.f32 %v428_v12 }
 0x1f6   : > { %v2873_v15 = vpop.eup %2872 }
 0x1f7   : > { %v430_v16 = vmul.f32 %v2873_v15, %v3425_v14 }
 0x1f9   : > { %v431_v17 = vsel %vm423_vm2, %v430_v16, 0.0 }
 0x1fa   : > { %432 = vadd.xlane.f32.xlu0 %v431_v17 }
 0x210   : > { %686 = vrot.lane.b32.xlu0 %v2575_v1, %s3115_s6 }
 0x214   : > { %1377 = vrot.lane.b32.xlu0 %v2589_v8, %s3115_s6 }
 0x218   : > { %1549 = vrot.lane.b32.xlu0 %v2589_v8, %s3116_s22 }
 0x21c   : > { %1894 = vrot.lane.b32.xlu0 %v2606_v19, %s3114_s25 }
 0x220   : > { %2067 = vrot.lane.b32.xlu0 %v2606_v19, %s3115_s6 }
 0x224   : > { %2239 = vrot.lane.b32.xlu0 %v2606_v19, %s3116_s22 }
 0x228   : > { %602 = vrot.lane.b32.xlu0 %v2576_v18, %s3114_s25 }
 0x283   : > { %v433_v22 = vpop.xlane.xlu0 %432 }
 0x284   : > { %2874 = vrcp.f32 %v433_v22 }
 0x287   : > { %v687_v28 = vpop.permute.xlu0 %686 }
 0x28b   : > { %v1378_v32 = vpop.permute.xlu0 %1377 }
 0x28f   : > { %v1550_v34 = vpop.permute.xlu0 %1549 }
 0x291   : > { %v2875_v25 = vpop.eup %2874 }
 0x292   : > { %v435_v26 = vmul.f32 %v2875_v25, %v430_v16 }
 0x293   : > { %v1895_v36 = vpop.permute.xlu0 %1894 }
 0x294   : > { %2685 = vmatmul.mubr.msk.f32.vlgmr.msra.gmra.mxu1 %vm423_vm2, %v435_v26  ;;  %v3526_v26 = vld [vmem:[%s3380_s7 + $0x10] sm:$0xff] }
 0x295   : > { %2688 = vmatpush3.xpose.msk.msra.mxu1 %vm345_vm1, %v513_v20  ;;  %2689 = vmatprep.mubr.msk.f32.mxu1 %vm3113_vm0, %v3112_v0 }
 0x296   : > { %2697 = vmatprep.subr.mxu1 %v3112_v0 }
 0x297   : > { %v2068_v38 = vpop.permute.xlu0 %2067 }
 0x298   : > { %2690 = vmatmul.mubr.msk.f32.vlgmr.msra.gmra.mxu1 %vm345_vm1, %v511_v21 }
 0x299   : > { %2698 = vmatpush3.xpose.msk.msra.mxu1 %vm345_vm1, %v687_v28  ;;  %2699 = vmatprep.mubr.msk.f32.mxu1 %vm3113_vm0, %v3112_v0 }
 0x29a   : > { %2707 = vmatprep.subr.mxu1 %v3112_v0 }
 0x29b   : > { %v2240_v40 = vpop.permute.xlu0 %2239 }
 0x29c   : > { %2700 = vmatmul.mubr.msk.f32.vlgmr.msra.gmra.mxu1 %vm345_vm1, %v685_v23 }
 0x29d   : > { %2708 = vmatpush3.xpose.msk.msra.mxu1 %vm345_vm1, %v860_v24  ;;  %2709 = vmatprep.mubr.msk.f32.mxu1 %vm3113_vm0, %v3112_v0 }
 0x29e   : > { %2717 = vmatprep.subr.mxu1 %v3112_v0 }
 0x29f   : > { %v603_v41 = vpop.permute.xlu0 %602 }
 0x2a0   : > { %2710 = vmatmul.mubr.msk.f32.vlgmr.msra.gmra.mxu1 %vm345_vm1, %v858_v27  ;;  %2693 = vmatpush3.msra.mxu0 %v603_v41  ;;  %v3532_v27 = vpop.permute.xlu1 %775 }
 0x2a1   : > { %2718 = vmatpush3.xpose.msk.msra.mxu1 %vm345_vm1, %v2590_v7  ;;  %2719 = vmatprep.mubr.msk.f32.mxu1 %vm3113_vm0, %v3112_v0 }
 0x2a2   : > { %2727 = vmatprep.subr.mxu1 %v3112_v0  ;;  %2702 = vmatprep.subr.mxu0 %v3112_v0 }
 0x2a4   : > { %2720 = vmatmul.mubr.msk.f32.vlgmr.msra.gmra.mxu1 %vm345_vm1, %v2589_v8  ;;  %v3534_v28 = vpop.permute.xlu1 %948 }
 0x2a5   : > { %2728 = vmatpush3.xpose.msk.msra.mxu1 %vm345_vm1, %v1207_v29  ;;  %2729 = vmatprep.mubr.msk.f32.mxu1 %vm3113_vm0, %v3112_v0 }
 0x2a6   : > { %2737 = vmatprep.subr.mxu1 %v3112_v0 }
 0x2a8   : > { %2730 = vmatmul.mubr.msk.f32.vlgmr.msra.gmra.mxu1 %vm345_vm1, %v1205_v30 }
 0x2a9   : > { %2738 = vmatpush3.xpose.msk.msra.mxu1 %vm345_vm1, %v1380_v31  ;;  %2739 = vmatprep.mubr.msk.f32.mxu1 %vm3113_vm0, %v3112_v0 }
 0x2aa   : > { %2747 = vmatprep.subr.mxu1 %v3112_v0 }
 0x2ac   : > { %2740 = vmatmul.mubr.msk.f32.vlgmr.msra.gmra.mxu1 %vm345_vm1, %v1378_v32 }
 0x2ad   : > { %2748 = vmatpush3.xpose.msk.msra.mxu1 %vm345_vm1, %v1552_v33  ;;  %2749 = vmatprep.mubr.msk.f32.mxu1 %vm3113_vm0, %v3112_v0 }
 0x2ae   : > { %2757 = vmatprep.subr.mxu1 %v3112_v0 }
 0x2b0   : > { %2750 = vmatmul.mubr.msk.f32.vlgmr.msra.gmra.mxu1 %vm345_vm1, %v1550_v34 }
 0x2b1   : > { %2758 = vmatpush3.xpose.msk.msra.mxu1 %vm345_vm1, %v3416_v9  ;;  %2759 = vmatprep.mubr.msk.f32.mxu1 %vm3113_vm0, %v3112_v0 }
 0x2b2   : > { %2767 = vmatprep.subr.mxu1 %v3112_v0 }
 0x2b4   : > { %2760 = vmatmul.mubr.msk.f32.vlgmr.msra.gmra.mxu1 %vm345_vm1, %v2606_v19 }
 0x2b5   : > { %2768 = vmatpush3.xpose.msk.msra.mxu1 %vm345_vm1, %v1897_v35  ;;  %2769 = vmatprep.mubr.msk.f32.mxu1 %vm3113_vm0, %v3112_v0 }
 0x2b6   : > { %2777 = vmatprep.subr.mxu1 %v3112_v0 }
 0x2b8   : > { %2770 = vmatmul.mubr.msk.f32.vlgmr.msra.gmra.mxu1 %vm345_vm1, %v1895_v36 }
 0x2b9   : > { %2778 = vmatpush3.xpose.msk.msra.mxu1 %vm345_vm1, %v2070_v37  ;;  %2779 = vmatprep.mubr.msk.f32.mxu1 %vm3113_vm0, %v3112_v0 }
 0x2ba   : > { %2787 = vmatprep.subr.mxu1 %v3112_v0 }
 0x2bc   : > { %2780 = vmatmul.mubr.msk.f32.vlgmr.msra.gmra.mxu1 %vm345_vm1, %v2068_v38 }
 0x2bd   : > { %2788 = vmatpush3.xpose.msk.msra.mxu1 %vm345_vm1, %v2242_v39  ;;  %2789 = vmatprep.mubr.msk.f32.mxu1 %vm3113_vm0, %v3112_v0 }
 0x2c0   : > { %2790 = vmatmul.mubr.msk.f32.vlgmr.msra.gmra.mxu1 %vm345_vm1, %v2240_v40 }
 0x354   : > { %v505_v42 = vpop.f32.mrf.mxu1 }
 0x355   : > { %509 = vst.msk [vmem:[#allocation2] sm:$0xff] %vm345_vm1, %v505_v42 }
 0x356   : > { %v2686_v43 = vpop.f32.mrf.mxu1 }
 0x358   : > { %v584_v44 = vpop.f32.mrf.mxu1 }
 0x359   : > { %v588_v45 = vmul.f32 0.17677669, %v584_v44 }
 0x35a   : > { %v2691_v46 = vpop.f32.mrf.mxu1 }
 0x35b   : > { %v589_v47 = vsel %vm423_vm2, %v588_v45, -inf }
 0x35c   : > { %590 = vmax.xlane.f32.xlu1 %v589_v47  ;;  %v758_v48 = vpop.f32.mrf.mxu1 }
 0x35d   : > { %v762_v49 = vmul.f32 0.17677669, %v758_v48 }
 0x35e   : > { %v2701_v50 = vpop.f32.mrf.mxu1 }
 0x35f   : > { %v763_v51 = vsel %vm423_vm2, %v762_v49, -inf }
 0x360   : > { %764 = vmax.xlane.f32.xlu0 %v763_v51  ;;  %v931_v52 = vpop.f32.mrf.mxu1 }
 0x361   : > { %v935_v53 = vmul.f32 0.17677669, %v931_v52  ;;  %v2592_v52 = vld [vmem:[%s3384_s1 + $0x8] sm:$0xff] }
 0x362   : > { %v2711_v54 = vpop.f32.mrf.mxu1 }
 0x363   : > { %v936_v55 = vsel %vm423_vm2, %v935_v53, -inf }
 0x364   : > { %937 = vmax.xlane.f32.xlu0 %v936_v55  ;;  %v1113_v56 = vpop.f32.mrf.mxu1 }
 0x365   : > { %v1117_v57 = vmul.f32 0.17677669, %v1113_v56  ;;  %v1040_v56 = vadd.f32 1e-08, %v2592_v52 }
 0x366   : > { %v2721_v58 = vpop.f32.mrf.mxu1 }
 0x367   : > { %v1118_v59 = vsel %vm423_vm2, %v1117_v57, -inf }
 0x368   : > { %1119 = vmax.xlane.f32.xlu1 %v1118_v59  ;;  %v1278_v60 = vpop.f32.mrf.mxu1 }
 0x369   : > { %v1282_v61 = vmul.f32 0.17677669, %v1278_v60 }
 0x36a   : > { %v2731_v62 = vpop.f32.mrf.mxu1 }
 0x36b   : > { %v1283_v63 = vsel %vm423_vm2, %v1282_v61, -inf }
 0x36c   : > { %1284 = vmax.xlane.f32.xlu0 %v1283_v63  ;;  %v1451_v1 = vpop.f32.mrf.mxu1 }
 0x36d   : > { %v1455_v2 = vmul.f32 0.17677669, %v1451_v1 }
 0x36e   : > { %v2741_v3 = vpop.f32.mrf.mxu1 }
 0x36f   : > { %v1456_v4 = vsel %vm423_vm2, %v1455_v2, -inf  ;;  %v3565_v3 = vld [vmem:[%s3380_s7] sm:$0xff] }
 0x370   : > { %1457 = vmax.xlane.f32.xlu1 %v1456_v4  ;;  %v1623_v5 = vpop.f32.mrf.mxu1 }
 0x371   : > { %v3505_v6 = vmul.f32 0.17677669, %v1623_v5 }
 0x372   : > { %v2751_v7 = vpop.f32.mrf.mxu1 }
 0x373   : > { %v1628_v8 = vsel %vm423_vm2, %v3505_v6, -inf }
 0x374   : > { %1629 = vmax.xlane.f32.xlu0 %v1628_v8  ;;  %v1803_v9 = vpop.f32.mrf.mxu1 }
 0x375   : > { %v3509_v10 = vmul.f32 0.17677669, %v1803_v9 }
 0x376   : > { %v2761_v11 = vpop.f32.mrf.mxu1 }
 0x377   : > { %v1808_v12 = vsel %vm423_vm2, %v3509_v10, -inf }
 0x378   : > { %1809 = vmax.xlane.f32.xlu1 %v1808_v12  ;;  %v1968_v13 = vpop.f32.mrf.mxu1 }
 0x379   : > { %v3513_v15 = vmul.f32 0.17677669, %v1968_v13 }
 0x37a   : > { %v2771_v16 = vpop.f32.mrf.mxu1 }
 0x37b   : > { %v1973_v17 = vsel %vm423_vm2, %v3513_v15, -inf }
 0x37c   : > { %1974 = vmax.xlane.f32.xlu0 %v1973_v17  ;;  %v2141_v18 = vpop.f32.mrf.mxu1 }
 0x37d   : > { %v3517_v19 = vmul.f32 0.17677669, %v2141_v18 }
 0x37e   : > { %v2781_v20 = vpop.f32.mrf.mxu1 }
 0x37f   : > { %v2146_v21 = vsel %vm423_vm2, %v3517_v19, -inf }
 0x380   : > { %2147 = vmax.xlane.f32.xlu1 %v2146_v21  ;;  %v2313_v22 = vpop.f32.mrf.mxu1 }
 0x381   : > { %v3521_v23 = vmul.f32 0.17677669, %v2313_v22 }
 0x382   : > { %v2791_v24 = vpop.f32.mrf.mxu1 }
 0x383   : > { %v2318_v25 = vsel %vm423_vm2, %v3521_v23, -inf  ;;  %v2607_v24 = vld [vmem:[%s3384_s1 + $0x10] sm:$0xff] }
 0x384   : > { %2319 = vmax.xlane.f32.xlu0 %v2318_v25 }
 0x391   : > { %1468 = vrot.lane.b32.xlu1 %v3526_v26, %s3115_s6 }
 0x39a   : > { %1296 = vrot.lane.b32.xlu0 %v3526_v26, %s3114_s25 }
 0x3e5   : > { %v591_v29 = vpop.xlane.xlu1 %590 }
 0x3e6   : > { %v592_v30 = vsub.f32 %v588_v45, %v591_v29 }
 0x3e8   : > { %v593_v31 = vmul.f32 1.442695, %v592_v30 }
 0x3e9   : > { %v765_v32 = vpop.xlane.xlu0 %764 }
 0x3ea   : > { %2876 = vpow2.f32 %v593_v31  ;;  %v766_v33 = vsub.f32 %v762_v49, %v765_v32 }
 0x3ec   : > { %v767_v34 = vmul.f32 1.442695, %v766_v33 }
 0x3ed   : > { %v938_v35 = vpop.xlane.xlu0 %937 }
 0x3ee   : > { %2878 = vpow2.f32 %v767_v34  ;;  %v939_v36 = vsub.f32 %v935_v53, %v938_v35 }
 0x3f0   : > { %v940_v37 = vmul.f32 1.442695, %v939_v36 }
 0x3f1   : > { %v1120_v38 = vpop.xlane.xlu1 %1119 }
 0x3f2   : > { %2880 = vpow2.f32 %v940_v37  ;;  %v1121_v39 = vsub.f32 %v1117_v57, %v1120_v38 }
 0x3f4   : > { %v1122_v40 = vmul.f32 1.442695, %v1121_v39 }
 0x3f5   : > { %v1285_v41 = vpop.xlane.xlu0 %1284 }
 0x3f6   : > { %2882 = vpow2.f32 %v1122_v40  ;;  %v1286_v42 = vsub.f32 %v1282_v61, %v1285_v41 }
 0x3f7   : > { %v2877_v43 = vpop.eup %2876 }
 0x3f8   : > { %v1287_v44 = vmul.f32 1.442695, %v1286_v42  ;;  %v3537_v45 = vmul.f32 %v2877_v43, %v3425_v14 }
 0x3f9   : > { %v1458_v46 = vpop.xlane.xlu1 %1457 }
 0x3fa   : > { %2884 = vpow2.f32 %v1287_v44  ;;  %v1459_v47 = vsub.f32 %v1455_v2, %v1458_v46  ;;  %v596_v48 = vsel %vm423_vm2, %v3537_v45, 0.0 }
 0x3fb   : > { %v2879_v49 = vpop.eup %2878  ;;  %597 = vadd.xlane.f32.xlu1 %v596_v48 }
 0x3fc   : > { %v1460_v50 = vmul.f32 1.442695, %v1459_v47  ;;  %v3542_v51 = vmul.f32 %v2879_v49, %v3425_v14 }
 0x3fd   : > { %v1630_v4 = vpop.xlane.xlu0 %1629 }
 0x3fe   : > { %2886 = vpow2.f32 %v1460_v50  ;;  %v770_v53 = vsel %vm423_vm2, %v3542_v51, 0.0  ;;  %v1631_v5 = vsub.f32 %v3505_v6, %v1630_v4 }
 0x3ff   : > { %v2881_v54 = vpop.eup %2880  ;;  %771 = vadd.xlane.f32.xlu0 %v770_v53 }
 0x400   : > { %v3548_v55 = vmul.f32 %v2881_v54, %v3425_v14  ;;  %v1632_v11 = vmul.f32 1.442695, %v1631_v5 }
 0x401   : > { %v1810_v7 = vpop.xlane.xlu1 %1809 }
 0x402   : > { %v943_v57 = vsel %vm423_vm2, %v3548_v55, 0.0  ;;  %v1811_v9 = vsub.f32 %v3509_v10, %v1810_v7  ;;  %2888 = vpow2.f32 %v1632_v11 }
 0x403   : > { %v2883_v58 = vpop.eup %2882  ;;  %944 = vadd.xlane.f32.xlu1 %v943_v57 }
 0x404   : > { %v3552_v59 = vmul.f32 %v2883_v58, %v1040_v56  ;;  %v1812_v17 = vmul.f32 1.442695, %v1811_v9 }
 0x405   : > { %v1975_v8 = vpop.xlane.xlu0 %1974 }
 0x406   : > { %v1125_v60 = vsel %vm423_vm2, %v3552_v59, 0.0  ;;  %v1976_v12 = vsub.f32 %v3513_v15, %v1975_v8  ;;  %2890 = vpow2.f32 %v1812_v17  ;;  %v1730_v15 = vadd.f32 1e-08, %v2607_v24 }
 0x407   : > { %v2885_v61 = vpop.eup %2884  ;;  %1126 = vadd.xlane.f32.xlu0 %v1125_v60 }
 0x408   : > { %v3556_v62 = vmul.f32 %v2885_v61, %v1040_v56  ;;  %v1977_v20 = vmul.f32 1.442695, %v1976_v12 }
 0x409   : > { %v2148_v13 = vpop.xlane.xlu1 %2147 }
 0x40a   : > { %v1290_v14 = vsel %vm423_vm2, %v3556_v62, 0.0  ;;  %v2149_v18 = vsub.f32 %v3517_v19, %v2148_v13  ;;  %2892 = vpow2.f32 %v1977_v20 }
 0x40b   : > { %v2887_v63 = vpop.eup %2886  ;;  %1291 = vadd.xlane.f32.xlu1 %v1290_v14 }
 0x40c   : > { %v3560_v1 = vmul.f32 %v2887_v63, %v1040_v56  ;;  %v2150_v21 = vmul.f32 1.442695, %v2149_v18 }
 0x40d   : > { %v2320_v16 = vpop.xlane.xlu0 %2319  ;;  %v1469_v40 = vpop.permute.xlu1 %1468 }
 0x40e   : > { %v1463_v2 = vsel %vm423_vm2, %v3560_v1, 0.0  ;;  %v2321_v6 = vsub.f32 %v3521_v23, %v2320_v16  ;;  %2894 = vpow2.f32 %v2150_v21 }
 0x40f   : > { %1464 = vadd.xlane.f32.xlu0 %v1463_v2  ;;  %v2889_v10 = vpop.eup %2888 }
 0x410   : > { %v2322_v22 = vmul.f32 1.442695, %v2321_v6  ;;  %v3577_v29 = vmul.f32 %v2889_v10, %v1040_v56 }
 0x411   : > { %v1297_v41 = vpop.permute.xlu0 %1296 }
 0x412   : > { %2896 = vpow2.f32 %v2322_v22  ;;  %v1635_v19 = vsel %vm423_vm2, %v3577_v29, 0.0 }
 0x413   : > { %v2891_v25 = vpop.eup %2890 }
 0x414   : > { %v3581_v32 = vmul.f32 %v2891_v25, %v1730_v15 }
 0x416   : > { %v1815_v34 = vsel %vm423_vm2, %v3581_v32, 0.0 }
 0x417   : > { %v2893_v30 = vpop.eup %2892 }
 0x418   : > { %v3583_v23 = vmul.f32 %v2893_v30, %v1730_v15 }
 0x41a   : > { %v1980_v35 = vsel %vm423_vm2, %v3583_v23, 0.0 }
 0x41b   : > { %v2895_v31 = vpop.eup %2894 }
 0x41c   : > { %1986 = vrot.lane.b32.xlu1 %v3565_v3, %s3114_s25  ;;  %v3589_v36 = vmul.f32 %v2895_v31, %v1730_v15 }
 0x41e   : > { %v2153_v38 = vsel %vm423_vm2, %v3589_v36, 0.0 }
 0x41f   : > { %v2897_v33 = vpop.eup %2896 }
 0x420   : > { %v3591_v37 = vmul.f32 %v2897_v33, %v1730_v15 }
 0x422   : > { %v2325_v39 = vsel %vm423_vm2, %v3591_v37, 0.0 }
 0x425   : > { %1640 = vrot.lane.b32.xlu0 %v3526_v26, %s3116_s22 }
 0x440   : > { %1636 = vadd.xlane.f32.xlu1 %v1635_v19 }
 0x444   : > { %1816 = vadd.xlane.f32.xlu1 %v1815_v34  ;;  %1981 = vadd.xlane.f32.xlu0 %v1980_v35 }
 0x448   : > { %2154 = vadd.xlane.f32.xlu1 %v2153_v38  ;;  %2326 = vadd.xlane.f32.xlu0 %v2325_v39 }
 0x459   : > { %2330 = vrot.lane.b32.xlu1 %v3565_v3, %s3116_s22 }
 0x45e   : > { %2158 = vrot.lane.b32.xlu0 %v3565_v3, %s3115_s6 }
 0x484   : > { %v598_v42 = vpop.xlane.xlu1 %597 }
 0x485   : > { %2898 = vrcp.f32 %v598_v42 }
 0x488   : > { %v772_v43 = vpop.xlane.xlu0 %771 }
 0x489   : > { %2900 = vrcp.f32 %v772_v43 }
 0x48c   : > { %v945_v44 = vpop.xlane.xlu1 %944 }
 0x48d   : > { %2902 = vrcp.f32 %v945_v44 }
 0x490   : > { %v1127_v46 = vpop.xlane.xlu0 %1126 }
 0x491   : > { %2904 = vrcp.f32 %v1127_v46 }
 0x492   : > { %v2899_v47 = vpop.eup %2898 }
 0x493   : > { %v600_v48 = vmul.f32 %v2899_v47, %v3537_v45 }
 0x494   : > { %v1292_v49 = vpop.xlane.xlu1 %1291 }
 0x495   : > { %2906 = vrcp.f32 %v1292_v49  ;;  %2695 = vmatmul.mubr.msk.f32.vlgmr.msra.gmra.mxu0 %vm423_vm2, %v600_v48 }
 0x496   : > { %v2901_v50 = vpop.eup %2900  ;;  %2703 = vmatpush3.msra.mxu0 %v3532_v27  ;;  %2704 = vmatprep.mubr.msk.f32.mxu0 %vm3113_vm0, %v3112_v0 }
 0x497   : > { %2712 = vmatprep.subr.mxu0 %v3112_v0  ;;  %v774_v52 = vmul.f32 %v2901_v50, %v3542_v51 }
 0x498   : > { %v1465_v53 = vpop.xlane.xlu0 %1464  ;;  %v1987_v58 = vpop.permute.xlu1 %1986 }
 0x499   : > { %2908 = vrcp.f32 %v1465_v53  ;;  %2705 = vmatmul.mubr.msk.f32.vlgmr.msra.gmra.mxu0 %vm423_vm2, %v774_v52 }
 0x49a   : > { %v2903_v54 = vpop.eup %2902  ;;  %2713 = vmatpush3.msra.mxu0 %v3534_v28  ;;  %2714 = vmatprep.mubr.msk.f32.mxu0 %vm3113_vm0, %v3112_v0 }
 0x49b   : > { %v947_v45 = vmul.f32 %v2903_v54, %v3548_v55  ;;  %2722 = vmatprep.subr.mxu0 %v3112_v0 }
 0x49c   : > { %v1641_v57 = vpop.permute.xlu0 %1640 }
 0x49d   : > { %2715 = vmatmul.mubr.msk.f32.vlgmr.msra.gmra.mxu0 %vm423_vm2, %v947_v45 }
 0x49e   : > { %v2905_v27 = vpop.eup %2904  ;;  %2723 = vmatpush3.msra.mxu0 %v3526_v26  ;;  %2724 = vmatprep.mubr.msk.f32.mxu0 %vm3113_vm0, %v3112_v0 }
 0x49f   : > { %2732 = vmatprep.subr.mxu0 %v3112_v0  ;;  %v1129_v51 = vmul.f32 %v2905_v27, %v3552_v59 }
 0x4a1   : > { %2725 = vmatmul.mubr.msk.f32.vlgmr.msra.gmra.mxu0 %vm423_vm2, %v1129_v51 }
 0x4a2   : > { %v2907_v28 = vpop.eup %2906  ;;  %2733 = vmatpush3.msra.mxu0 %v1297_v41  ;;  %2734 = vmatprep.mubr.msk.f32.mxu0 %vm3113_vm0, %v3112_v0 }
 0x4a3   : > { %2742 = vmatprep.subr.mxu0 %v3112_v0  ;;  %v1294_v55 = vmul.f32 %v2907_v28, %v3556_v62 }
 0x4a5   : > { %2735 = vmatmul.mubr.msk.f32.vlgmr.msra.gmra.mxu0 %vm423_vm2, %v1294_v55 }
 0x4a6   : > { %v2909_v26 = vpop.eup %2908  ;;  %2743 = vmatpush3.msra.mxu0 %v1469_v40  ;;  %2744 = vmatprep.mubr.msk.f32.mxu0 %vm3113_vm0, %v3112_v0 }
 0x4a7   : > { %2752 = vmatprep.subr.mxu0 %v3112_v0  ;;  %v1467_v56 = vmul.f32 %v2909_v26, %v3560_v1 }
 0x4a9   : > { %2745 = vmatmul.mubr.msk.f32.vlgmr.msra.gmra.mxu0 %vm423_vm2, %v1467_v56 }
 0x4aa   : > { %2753 = vmatpush3.msra.mxu0 %v1641_v57  ;;  %2754 = vmatprep.mubr.msk.f32.mxu0 %vm3113_vm0, %v3112_v0 }
 0x4ab   : > { %2762 = vmatprep.subr.mxu0 %v3112_v0 }
 0x4c9   : > { %v1637_v59 = vpop.xlane.xlu1 %1636 }
 0x4ca   : > { %2910 = vrcp.f32 %v1637_v59 }
 0x4cd   : > { %v1817_v60 = vpop.xlane.xlu1 %1816  ;;  %v1982_v61 = vpop.xlane.xlu0 %1981 }
 0x4ce   : > { %2912 = vrcp.f32 %v1817_v60 }
 0x4cf   : > { %2914 = vrcp.f32 %v1982_v61 }
 0x4d1   : > { %v2155_v62 = vpop.xlane.xlu1 %2154  ;;  %v2327_v14 = vpop.xlane.xlu0 %2326 }
 0x4d2   : > { %2916 = vrcp.f32 %v2155_v62 }
 0x4d3   : > { %2918 = vrcp.f32 %v2327_v14 }
 0x4d5   : > { %v2159_v7 = vpop.permute.xlu0 %2158  ;;  %v2331_v9 = vpop.permute.xlu1 %2330 }
 0x4d7   : > { %v2911_v63 = vpop.eup %2910 }
 0x4d8   : > { %v1639_v1 = vmul.f32 %v2911_v63, %v3577_v29 }
 0x4da   : > { %2755 = vmatmul.mubr.msk.f32.vlgmr.msra.gmra.mxu0 %vm423_vm2, %v1639_v1 }
 0x4db   : > { %v2913_v2 = vpop.eup %2912  ;;  %2763 = vmatpush3.msra.mxu0 %v3565_v3  ;;  %2764 = vmatprep.mubr.msk.f32.mxu0 %vm3113_vm0, %v3112_v0 }
 0x4dc   : > { %2772 = vmatprep.subr.mxu0 %v3112_v0  ;;  %v1819_v4 = vmul.f32 %v2913_v2, %v3581_v32  ;;  %v2915_v5 = vpop.eup %2914 }
 0x4dd   : > { %v1984_v8 = vmul.f32 %v2915_v5, %v3583_v23 }
 0x4de   : > { %2765 = vmatmul.mubr.msk.f32.vlgmr.msra.gmra.mxu0 %vm423_vm2, %v1819_v4 }
 0x4df   : > { %2773 = vmatpush3.msra.mxu0 %v1987_v58  ;;  %2774 = vmatprep.mubr.msk.f32.mxu0 %vm3113_vm0, %v3112_v0  ;;  %v2917_v3 = vpop.eup %2916 }
 0x4e0   : > { %2782 = vmatprep.subr.mxu0 %v3112_v0  ;;  %v2157_v11 = vmul.f32 %v2917_v3, %v3589_v36  ;;  %v2919_v12 = vpop.eup %2918 }
 0x4e1   : > { %v2329_v13 = vmul.f32 %v2919_v12, %v3591_v37 }
 0x4e2   : > { %2775 = vmatmul.mubr.msk.f32.vlgmr.msra.gmra.mxu0 %vm423_vm2, %v1984_v8 }
 0x4e3   : > { %2783 = vmatpush3.msra.mxu0 %v2159_v7  ;;  %2784 = vmatprep.mubr.msk.f32.mxu0 %vm3113_vm0, %v3112_v0 }
 0x4e4   : > { %2792 = vmatprep.subr.mxu0 %v3112_v0 }
 0x4e6   : > { %2785 = vmatmul.mubr.msk.f32.vlgmr.msra.gmra.mxu0 %vm423_vm2, %v2157_v11 }
 0x4e7   : > { %2793 = vmatpush3.msra.mxu0 %v2331_v9  ;;  %2794 = vmatprep.mubr.msk.f32.mxu0 %vm3113_vm0, %v3112_v0 }
 0x4ea   : > { %2795 = vmatmul.mubr.msk.f32.vlgmr.msra.gmra.mxu0 %vm423_vm2, %v2329_v13 }
 0x555   : > { %v674_v16 = vpop.f32.mrf.mxu0 }
 0x556   : > { %679 = vrot.lane.b32.xlu0 %v674_v16, %s3116_s22 }
 0x557   : > { %v2696_v17 = vpop.f32.mrf.mxu0 }
 0x559   : > { %v847_v18 = vpop.f32.mrf.mxu0 }
 0x55a   : > { %852 = vrot.lane.b32.xlu1 %v847_v18, %s3115_s6 }
 0x55b   : > { %v2706_v20 = vpop.f32.mrf.mxu0 }
 0x55d   : > { %v1020_v6 = vpop.f32.mrf.mxu0 }
 0x55e   : > { %1025 = vrot.lane.b32.xlu0 %v1020_v6, %s3114_s25 }
 0x55f   : > { %v2716_v21 = vpop.f32.mrf.mxu0 }
 0x561   : > { %v1199_v22 = vpop.f32.mrf.mxu0 }
 0x563   : > { %v2726_v10 = vpop.f32.mrf.mxu0 }
 0x565   : > { %v1368_v24 = vpop.f32.mrf.mxu0 }
 0x566   : > { %1373 = vrot.lane.b32.xlu1 %v1368_v24, %s3116_s22 }
 0x567   : > { %v2736_v0 = vpop.f32.mrf.mxu0 }
 0x569   : > { %v1540_v25 = vpop.f32.mrf.mxu0 }
 0x56a   : > { %1545 = vrot.lane.b32.xlu0 %v1540_v25, %s3115_s6 }
 0x56b   : > { %v2746_v29 = vpop.f32.mrf.mxu0 }
 0x59a   : > { %v1712_v15 = vpop.f32.mrf.mxu0 }
 0x59b   : > { %1717 = vrot.lane.b32.xlu1 %v1712_v15, %s3114_s25 }
 0x59c   : > { %v2756_v30 = vpop.f32.mrf.mxu0 }
 0x59e   : > { %v1889_v31 = vpop.f32.mrf.mxu0 }
 0x5a0   : > { %v2766_v19 = vpop.f32.mrf.mxu0 }
 0x5a2   : > { %v2058_v32 = vpop.f32.mrf.mxu0 }
 0x5a3   : > { %2063 = vrot.lane.b32.xlu0 %v2058_v32, %s3116_s22 }
 0x5a4   : > { %v2776_v23 = vpop.f32.mrf.mxu0 }
 0x5a6   : > { %v2230_v33 = vpop.f32.mrf.mxu0 }
 0x5a7   : > { %2235 = vrot.lane.b32.xlu1 %v2230_v33, %s3115_s6 }
 0x5a8   : > { %v2786_v34 = vpop.f32.mrf.mxu0 }
 0x5aa   : > { %v2402_v35 = vpop.f32.mrf.mxu0 }
 0x5ab   : > { %2407 = vrot.lane.b32.xlu0 %v2402_v35, %s3114_s25 }
 0x5ac   : > { %v2796_v36 = vpop.f32.mrf.mxu0 }
 0x5c8   : > { %v680_v37 = vpop.permute.xlu0 %679 }
 0x5c9   : > { %683 = vst.msk [vmem:[#allocation2] sm:$0xff] %vm682_vm3, %v680_v37 }
 0x5cc   : > { %v853_v38 = vpop.permute.xlu1 %852 }
 0x5cd   : > { %856 = vst.msk [vmem:[#allocation2] sm:$0xff] %vm855_vm4, %v853_v38 }
 0x5d0   : > { %v1026_v39 = vpop.permute.xlu0 %1025 }
 0x5d1   : > { %1029 = vst.msk [vmem:[#allocation2] sm:$0xff] %vm1028_vm5, %v1026_v39 }
 0x5d8   : > { %v1030_v40 = vld [vmem:[#allocation2] sm:$0xff]  ;;  %v1374_v41 = vpop.permute.xlu1 %1373 }
 0x5d9   : > { %1031 = vst [vmem:[%s332_s9] sm:$0xff] %v1030_v40  ;;  %1203 = vst.msk [vmem:[#allocation2] sm:$0xff] %vm345_vm1, %v1199_v22 }
 0x5da   : > { %1376 = vst.msk [vmem:[#allocation2] sm:$0xff] %vm682_vm3, %v1374_v41 }
 0x5dc   : > { %v1546_v42 = vpop.permute.xlu0 %1545 }
 0x5dd   : > { %1548 = vst.msk [vmem:[#allocation2] sm:$0xff] %vm855_vm4, %v1546_v42 }
 0x60d   : > { %v1718_v43 = vpop.permute.xlu1 %1717 }
 0x60e   : > { %1720 = vst.msk [vmem:[#allocation2] sm:$0xff] %vm1028_vm5, %v1718_v43 }
 0x615   : > { %v1721_v44 = vld [vmem:[#allocation2] sm:$0xff]  ;;  %v2064_v46 = vpop.permute.xlu0 %2063 }
 0x616   : > { %2605 = vst [vmem:[%s332_s9 + $0x8] sm:$0xff] %v1721_v44  ;;  %1893 = vst.msk [vmem:[#allocation2] sm:$0xff] %vm345_vm1, %v1889_v31 }
 0x617   : > { %2066 = vst.msk [vmem:[#allocation2] sm:$0xff] %vm682_vm3, %v2064_v46 }
 0x619   : > { %v2236_v47 = vpop.permute.xlu1 %2235 }
 0x61a   : > { %2238 = vst.msk [vmem:[#allocation2] sm:$0xff] %vm855_vm4, %v2236_v47 }
 0x61d   : > { %v2408_v48 = vpop.permute.xlu0 %2407 }
 0x61e   : > { %2410 = vst.msk [vmem:[#allocation2] sm:$0xff] %vm1028_vm5, %v2408_v48 }
 0x625   : > { %v2411_v49 = vld [vmem:[#allocation2] sm:$0xff] }
 0x626   : > { %2620 = vst [vmem:[%s332_s9 + $0x10] sm:$0xff] %v2411_v49 }
 0x627   : > { %3045 = shalt.err (!%p3042_p0)
}
 0x628   : > { %s3046_s17 = scalar_lea.hbm %s3681_s28, 384  ;;  %s3050_s13 = scalar_lea.hbm %s3730_s4, 768 }
 0x629   : > { %p3047_p11 = scmp.ne.s32.totalorder %s3681_s28, %s3046_s17  ;;  %p3051_p7 = scmp.lt.s32.totalorder %s3681_s28, %s3730_s4 }
 0x62a   : > { %p3052_p2 = scmp.lt.s32.totalorder %s3050_s13, %s3046_s17 }
 0x62b   : > { %p3048_p4 = pnand %p3047_p11, %p3758_p10 }
 0x62c   : > { %p3053_p8 = por %p3052_p2, %p3051_p7 }
 0x62d   : > { %p3049_p5 = pneg %p3048_p4 }
 0x62f   : > { %p3054_p13 = pnand %p3053_p8, %p3049_p5 }
 0x631   : > { %3057 = shalt.err (!%p3054_p13)
}
 0x632   : > { %s3118_s21 = smov 128   ;;  %s3119_s1 = smov 8  }
 0x633   : > { %2810 = dma.vmem_to_hbm [thread:$0]  (%p3758_p10), %s3683_s8, 384, %s3681_s28, %s2415_s30, %s3118_s21, %s3118_s21, %s3119_s1  }
 0x634 PF: > { %s2443_s25 = sand.u32 1, %s3092_s15   ;;  %p3759_p1 = scmp.ne.s32.totalorder %s3747_s27, 0 }
 0x635   : > { %p3760_p3 = scmp.ge.s32.totalorder %s3104_s18, 2  ;;  %s2444_s6 = scalar_lea.sflag [#allocation5], %s2443_s25 }
 0x637   : > { %p2826_p9 = pnand %p3760_p3, %p3759_p1 }
 0x639   : > { %p2827_p6 = pneg %p2826_p9 }
 0x63b   : > { %3087 = dma.done.wait (%p2827_p6), %s2444_s6, 384  }
 0x63c   : > { %3089 = vsyncadd (%p2827_p6), %s2444_s6, 4294966912  ;;  %s3761_s18 = sld [smem:[#allocation17_spill]]  ;;  %s3764_s15 = smov %s3096_s16 }
 0x63d   : > { %s3762_s22 = sld [smem:[#allocation16_spill]] }
 0x63e   : > { %s3763_s17 = sld [smem:[#allocation18_spill]] }
 0x642   : > { %p23_p12 = scmp.ge.s32.totalorder %s3761_s18, 4  }
 0x643   : > { %s3765_s16 = smov %s3762_s22 }
 0x644   :  { %25 = sbr.rel (!%p23_p12) target bundleno = 12 (0xc), region = 128 }
 0x649   :  { %2449 = vsyncpa [#allocation4], 1 }
 0x64a   :  { %2451 = vsyncpa [#allocation4 + $0x1], 1 }
 0x64b   :  { %2452 = vsyncpa [#allocation7], 1 }
 0x64c   :  { %2454 = vsyncpa [#allocation7 + $0x1], 1 }
 0x64d   :  { %2455 = vsyncpa [#allocation10], 1 }
 0x64e   :  { %2457 = vsyncpa [#allocation10 + $0x1], 1 }
 0x64f   :  { %2458 = vsyncpa [#allocation5], 1 }
 0x650   :  { %2460 = vsyncpa [#allocation5 + $0x1], 1 }

</bundles_post_ra>
